<compile_context>
chip_gen: v6e
topology: v6e:2x2x1
jax: 0.10.0
libtpu: 0.0.40
codegen_flags: <defaults>
</compile_context>

<pallas_src>
import jax
import jax.numpy as jnp
from jax.experimental import pallas as pl
from jax.experimental.pallas import tpu as pltpu


def _round_up(x, m):
    return ((x + m - 1) // m) * m


# ----------------------------- fused Pallas kernel ---------------------------

def _nature_cnn_kernel(x_ref, w1_ref, b1_ref, w2_ref, b2_ref, w3_ref, b3_ref,
                       o_ref):
    # x_ref: (B, HB, WB, 16*Cin) bf16 -- space-to-depth input block.
    B, HB, WB, _ = x_ref.shape
    OH1, OW1 = HB - 1, WB - 1                  # conv1 (k=8,s=4) output spatial
    PW1 = _round_up(OW1, 8)
    C1 = 32
    OH2, OW2 = (OH1 - 4) // 2 + 1, (OW1 - 4) // 2 + 1   # conv2 (k=4,s=2)
    PW2 = _round_up(OW2, 8)
    C2 = 64
    OH3, OW3 = OH2 - 2, OW2 - 2                # conv3 (k=3,s=1)
    PW3 = _round_up(OW3, 8)

    # ---- conv1: k=8,s=4 == k=2,s=1 on the space-to-depth input -> one matmul.
    slabs = [x_ref[:, ki:ki + OH1, kj:kj + OW1, :]
             for ki in (0, 1) for kj in (0, 1)]
    p1 = jnp.concatenate(slabs, axis=-1)                       # (B,OH1,OW1,K1)
    if PW1 > OW1:
        p1 = jnp.concatenate(
            [p1, jnp.zeros((B, OH1, PW1 - OW1, p1.shape[-1]), p1.dtype)],
            axis=2)
    p1 = p1.reshape(B * OH1 * PW1, p1.shape[-1])
    h1 = jnp.dot(p1, w1_ref[...], preferred_element_type=jnp.float32)
    h1 = jnp.maximum(h1 + b1_ref[...], 0.0)                    # f32 epilogue
    h1 = h1.astype(jnp.bfloat16).reshape(B, OH1, PW1, C1)

    # ---- conv2: k=4,s=2 -> strided patch gather (static slices) + one matmul.
    parts = []
    for i in range(4):
        rows = jnp.concatenate(
            [h1[:, i + 2 * r:i + 2 * r + 1, :, :] for r in range(OH2)], axis=1)
        for j in range(4):
            parts.append(jnp.concatenate(
                [rows[:, :, j + 2 * c:j + 2 * c + 1, :] for c in range(OW2)],
                axis=2))
    p2 = jnp.concatenate(parts, axis=-1)                       # (B,OH2,OW2,512)
    if PW2 > OW2:
        p2 = jnp.concatenate(
            [p2, jnp.zeros((B, OH2, PW2 - OW2, p2.shape[-1]), p2.dtype)],
            axis=2)
    p2 = p2.reshape(B * OH2 * PW2, p2.shape[-1])
    h2 = jnp.dot(p2, w2_ref[...], preferred_element_type=jnp.float32)
    h2 = jnp.maximum(h2 + b2_ref[...], 0.0)
    h2 = h2.astype(jnp.bfloat16).reshape(B, OH2, PW2, C2)

    # ---- conv3: k=3,s=1 -> nine shifted contiguous slabs + one matmul.
    slabs3 = [h2[:, i:i + OH3, j:j + OW3, :]
              for i in range(3) for j in range(3)]
    p3 = jnp.concatenate(slabs3, axis=-1)                      # (B,OH3,OW3,576)
    if PW3 > OW3:
        p3 = jnp.concatenate(
            [p3, jnp.zeros((B, OH3, PW3 - OW3, p3.shape[-1]), p3.dtype)],
            axis=2)
    p3 = p3.reshape(B * OH3 * PW3, p3.shape[-1])
    h3 = jnp.dot(p3, w3_ref[...], preferred_element_type=jnp.float32)
    h3 = jnp.maximum(h3 + b3_ref[...], 0.0)                    # (M, 128) padded
    o_ref[...] = h3.reshape(B, OH3, PW3, o_ref.shape[-1])      # lane-dense store


# ----------------------------- params / preprocessing ------------------------

def init_nature_cnn_params(in_channels, key):
    """Deterministic parameter init (scaled normal; stands in for orthogonal)."""
    k1, k2, k3 = jax.random.split(key, 3)

    def init_conv(k, out_c, in_c, kh, kw):
        fan_in = in_c * kh * kw
        w = jax.random.normal(k, (out_c, in_c, kh, kw), jnp.float32)
        w = w * (jnp.sqrt(2.0) / jnp.sqrt(float(fan_in)))
        b = jnp.zeros((out_c,), jnp.float32)
        return w, b

    # TODO(synk): orthogonal init (torch.nn.init.orthogonal_, gain sqrt(2))
    # replaced by deterministic scaled-normal init; forward semantics unchanged.
    w1, b1 = init_conv(k1, 32, in_channels, 8, 8)
    w2, b2 = init_conv(k2, 64, 32, 4, 4)
    w3, b3 = init_conv(k3, 64, 64, 3, 3)
    return {"w1": w1, "b1": b1, "w2": w2, "b2": b2, "w3": w3, "b3": b3}


def preprocess_params(params):
    """One-time repack of conv weights into kernel matmul layout (bf16).

    conv1 is rearranged for the space-to-depth input (feature order
    (ki,kj,ri,rj,c)); conv2/3 go to (KH*KW*Cin, Cout) with feature order
    (i,j,c); conv3 out-channels are zero-padded to 128 for lane-dense stores.
    """
    w1, w2, w3 = params["w1"], params["w2"], params["w3"]
    c_in = w1.shape[1]
    w1p = (w1.reshape(32, c_in, 2, 4, 2, 4)
             .transpose(2, 4, 3, 5, 1, 0)
             .reshape(2 * 2 * 4 * 4 * c_in, 32))
    w2p = w2.transpose(2, 3, 1, 0).reshape(4 * 4 * 32, 64)
    w3p = w3.transpose(2, 3, 1, 0).reshape(3 * 3 * 64, 64)
    w3p = jnp.concatenate([w3p, jnp.zeros((w3p.shape[0], 64), w3p.dtype)],
                          axis=1)
    b3p = jnp.concatenate([params["b3"], jnp.zeros((64,), jnp.float32)])
    return {
        "w1p": w1p.astype(jnp.bfloat16),
        "w2p": w2p.astype(jnp.bfloat16),
        "w3p": w3p.astype(jnp.bfloat16),
        "b1": params["b1"].reshape(1, 32).astype(jnp.float32),
        "b2": params["b2"].reshape(1, 64).astype(jnp.float32),
        "b3": b3p.reshape(1, 128).astype(jnp.float32),
    }


# --------------------------------- forward -----------------------------------

def nature_cnn_forward(kparams, obs, *, block_batch=8):
    """obs: (N, C, H, W) float32 -> flattened features (N, 64*OH3*OW3)."""
    N, C, H, W = obs.shape
    assert H % 4 == 0 and W % 4 == 0, "spatial dims must be multiples of 4"
    HB, WB = H // 4, W // 4
    OH1, OW1 = HB - 1, WB - 1
    OH2, OW2 = (OH1 - 4) // 2 + 1, (OW1 - 4) // 2 + 1
    OH3, OW3 = OH2 - 2, OW2 - 2
    PW3 = _round_up(OW3, 8)
    k1 = 4 * 16 * C

    # Space-to-depth (pure permutation, no data duplication): turns the
    # stride-4 conv1 into a stride-1 conv so all patch extraction can happen
    # in-kernel with static contiguous slices.
    x = obs.transpose(0, 2, 3, 1)
    x = (x.reshape(N, HB, 4, WB, 4, C)
          .transpose(0, 1, 3, 2, 4, 5)
          .reshape(N, HB, WB, 16 * C)
          .astype(jnp.bfloat16))

    bb = max(1, min(block_batch, N))
    n_pad = _round_up(N, bb)
    if n_pad != N:
        x = jnp.pad(x, ((0, n_pad - N), (0, 0), (0, 0), (0, 0)))

    flops = 2 * n_pad * (OH1 * _round_up(OW1, 8) * k1 * 32
                         + OH2 * _round_up(OW2, 8) * 512 * 64
                         + OH3 * PW3 * 576 * 128)
    bytes_accessed = (x.size * 2
                      + (k1 * 32 + 512 * 64 + 576 * 128) * 2
                      + n_pad * OH3 * PW3 * 128 * 4)

    out = pl.pallas_call(
        _nature_cnn_kernel,
        out_shape=jax.ShapeDtypeStruct((n_pad, OH3, PW3, 128), jnp.float32),
        grid=(n_pad // bb,),
        in_specs=[
            pl.BlockSpec((bb, HB, WB, 16 * C), lambda b: (b, 0, 0, 0)),
            pl.BlockSpec((k1, 32), lambda b: (0, 0)),
            pl.BlockSpec((1, 32), lambda b: (0, 0)),
            pl.BlockSpec((512, 64), lambda b: (0, 0)),
            pl.BlockSpec((1, 64), lambda b: (0, 0)),
            pl.BlockSpec((576, 128), lambda b: (0, 0)),
            pl.BlockSpec((1, 128), lambda b: (0, 0)),
        ],
        out_specs=pl.BlockSpec((bb, OH3, PW3, 128), lambda b: (b, 0, 0, 0)),
        compiler_params=pltpu.CompilerParams(
            dimension_semantics=("parallel",),
            vmem_limit_bytes=32 * 1024 * 1024),
        cost_estimate=pl.CostEstimate(
            flops=flops, transcendentals=0, bytes_accessed=bytes_accessed),
    )(x, kparams["w1p"], kparams["b1"], kparams["w2p"], kparams["b2"],
      kparams["w3p"], kparams["b3"])

    y = out[:N, :, :OW3, :64]                       # drop batch/width/channel pad
    # nn.Flatten() of NCHW conv output: channel-major, then spatial.
    return y.transpose(0, 3, 1, 2).reshape(N, 64 * OH3 * OW3)


# ----------------------------- plain-JAX reference ---------------------------

def nature_cnn_reference(params, obs):
    """Reference using lax.conv (bf16 operands, f32 accumulate, like the kernel)."""
    def conv(x, w, b, s):
        y = jax.lax.conv_general_dilated(
            x.astype(jnp.bfloat16), w.astype(jnp.bfloat16),
            window_strides=(s, s), padding="VALID",
            dimension_numbers=("NCHW", "OIHW", "NCHW"),
            preferred_element_type=jnp.float32)
        return jnp.maximum(y + b.reshape(1, -1, 1, 1), 0.0)

    x = conv(obs, params["w1"], params["b1"], 4)
    x = conv(x, params["w2"], params["b2"], 2)
    x = conv(x, params["w3"], params["b3"], 1)
    return x.reshape(x.shape[0], -1)


# ----------------------------------- main -------------------------------------

if __name__ == "__main__":
    key = jax.random.PRNGKey(0)
    pkey, xkey = jax.random.split(key)

    # Small shapes consistent with the module: 36x36 spatial gives conv output
    # sizes 8 -> 3 -> 1 for kernels 8/4/3 with strides 4/2/1.
    batch, in_channels, H, W = 4, 4, 36, 36
    params = init_nature_cnn_params(in_channels, pkey)
    kparams = preprocess_params(params)
    obs = jax.random.normal(xkey, (batch, in_channels, H, W), jnp.float32)

    fwd = jax.jit(lambda p, o: nature_cnn_forward(p, o, block_batch=2))
    out = jax.block_until_ready(fwd(kparams, obs))

    assert out.shape == (batch, 64 * 1 * 1), out.shape
    assert out.dtype == jnp.float32

    ref = jax.block_until_ready(nature_cnn_reference(params, obs))
    assert jnp.allclose(out, ref, atol=1e-2, rtol=1e-2), float(
        jnp.max(jnp.abs(out - ref)))

    print("KERNEL_OK")
</pallas_src>

<mosaic_0001>
module attributes {stable_mosaic.version = 11 : i64} {
  func.func @_nature_cnn_kernel(%arg0: i32, %arg1: memref<2x9x9x64xbf16, #tpu.memory_space<vmem>>, %arg2: memref<256x32xbf16, #tpu.memory_space<vmem>>, %arg3: memref<1x32xf32, #tpu.memory_space<vmem>>, %arg4: memref<512x64xbf16, #tpu.memory_space<vmem>>, %arg5: memref<1x64xf32, #tpu.memory_space<vmem>>, %arg6: memref<576x128xbf16, #tpu.memory_space<vmem>>, %arg7: memref<1x128xf32, #tpu.memory_space<vmem>>, %arg8: memref<2x1x8x128xf32, #tpu.memory_space<vmem>>) attributes {dimension_semantics = [#tpu.dimension_semantics<parallel>], iteration_bounds = array<i64: 2>, scalar_prefetch = 0 : i64, scratch_operands = 0 : i64, tpu.core_type = #tpu.core_type<tc>, window_params = [{transform_indices = @transform_0, window_bounds = array<i64: 2, 9, 9, 64>}, {pipeline_mode = #tpu.pipeline_mode<synchronous>, transform_indices = @transform_1, window_bounds = array<i64: 256, 32>}, {pipeline_mode = #tpu.pipeline_mode<synchronous>, transform_indices = @transform_2, window_bounds = array<i64: 1, 32>}, {pipeline_mode = #tpu.pipeline_mode<synchronous>, transform_indices = @transform_3, window_bounds = array<i64: 512, 64>}, {pipeline_mode = #tpu.pipeline_mode<synchronous>, transform_indices = @transform_4, window_bounds = array<i64: 1, 64>}, {pipeline_mode = #tpu.pipeline_mode<synchronous>, transform_indices = @transform_5, window_bounds = array<i64: 576, 128>}, {pipeline_mode = #tpu.pipeline_mode<synchronous>, transform_indices = @transform_6, window_bounds = array<i64: 1, 128>}, {transform_indices = @transform_7, window_bounds = array<i64: 2, 1, 8, 128>}]} {
    %c0 = arith.constant 0 : index
    %c0_0 = arith.constant 0 : index
    %c0_1 = arith.constant 0 : index
    %c0_2 = arith.constant 0 : index
    %0 = vector.load %arg1[%c0, %c0_0, %c0_1, %c0_2] : memref<2x9x9x64xbf16, #tpu.memory_space<vmem>>, vector<2x8x8x64xbf16>
    %c0_3 = arith.constant 0 : index
    %c0_4 = arith.constant 0 : index
    %c1 = arith.constant 1 : index
    %c0_5 = arith.constant 0 : index
    %1 = vector.load %arg1[%c0_3, %c0_4, %c1, %c0_5] : memref<2x9x9x64xbf16, #tpu.memory_space<vmem>>, vector<2x8x8x64xbf16>
    %c0_6 = arith.constant 0 : index
    %c1_7 = arith.constant 1 : index
    %c0_8 = arith.constant 0 : index
    %c0_9 = arith.constant 0 : index
    %2 = vector.load %arg1[%c0_6, %c1_7, %c0_8, %c0_9] : memref<2x9x9x64xbf16, #tpu.memory_space<vmem>>, vector<2x8x8x64xbf16>
    %c0_10 = arith.constant 0 : index
    %c1_11 = arith.constant 1 : index
    %c1_12 = arith.constant 1 : index
    %c0_13 = arith.constant 0 : index
    %3 = vector.load %arg1[%c0_10, %c1_11, %c1_12, %c0_13] : memref<2x9x9x64xbf16, #tpu.memory_space<vmem>>, vector<2x8x8x64xbf16>
    %4 = tpu.concatenate %0, %1, %2, %3 in 3 : vector<2x8x8x64xbf16>, vector<2x8x8x64xbf16>, vector<2x8x8x64xbf16>, vector<2x8x8x64xbf16> -> vector<2x8x8x256xbf16>
    %5 = vector.shape_cast %4 : vector<2x8x8x256xbf16> to vector<128x256xbf16>
    %c0_14 = arith.constant 0 : index
    %c0_15 = arith.constant 0 : index
    %6 = vector.load %arg2[%c0_14, %c0_15] : memref<256x32xbf16, #tpu.memory_space<vmem>>, vector<256x32xbf16>
    %cst = arith.constant dense<0.000000e+00> : vector<128x32xf32>
    %7 = tpu.matmul %5, %6, %cst {dimension_numbers = #tpu.dot_dimension_numbers<[1], [0], [0], [1], [0, 0, 1, 1], [], []>} : vector<128x256xbf16>, vector<256x32xbf16>, vector<128x32xf32> -> vector<128x32xf32>
    %c0_16 = arith.constant 0 : index
    %c0_17 = arith.constant 0 : index
    %8 = vector.load %arg3[%c0_16, %c0_17] : memref<1x32xf32, #tpu.memory_space<vmem>>, vector<1x32xf32>
    %9 = vector.broadcast %8 : vector<1x32xf32> to vector<128x32xf32>
    %10 = arith.addf %7, %9 : vector<128x32xf32>
    %cst_18 = arith.constant 0.000000e+00 : f32
    %11 = vector.broadcast %cst_18 : f32 to vector<128x32xf32>
    %12 = arith.maximumf %10, %11 : vector<128x32xf32>
    %13 = arith.truncf %12 : vector<128x32xf32> to vector<128x32xbf16>
    %14 = vector.shape_cast %13 : vector<128x32xbf16> to vector<2x8x8x32xbf16>
    %15 = vector.extract_strided_slice %14 {offsets = [0, 0, 0, 0], sizes = [2, 1, 8, 32], strides = [1, 1, 1, 1]} : vector<2x8x8x32xbf16> to vector<2x1x8x32xbf16>
    %16 = vector.extract_strided_slice %14 {offsets = [0, 2, 0, 0], sizes = [2, 1, 8, 32], strides = [1, 1, 1, 1]} : vector<2x8x8x32xbf16> to vector<2x1x8x32xbf16>
    %17 = vector.extract_strided_slice %14 {offsets = [0, 4, 0, 0], sizes = [2, 1, 8, 32], strides = [1, 1, 1, 1]} : vector<2x8x8x32xbf16> to vector<2x1x8x32xbf16>
    %18 = tpu.concatenate %15, %16, %17 in 1 : vector<2x1x8x32xbf16>, vector<2x1x8x32xbf16>, vector<2x1x8x32xbf16> -> vector<2x3x8x32xbf16>
    %19 = vector.extract_strided_slice %18 {offsets = [0, 0, 0, 0], sizes = [2, 3, 1, 32], strides = [1, 1, 1, 1]} : vector<2x3x8x32xbf16> to vector<2x3x1x32xbf16>
    %20 = vector.extract_strided_slice %18 {offsets = [0, 0, 2, 0], sizes = [2, 3, 1, 32], strides = [1, 1, 1, 1]} : vector<2x3x8x32xbf16> to vector<2x3x1x32xbf16>
    %21 = vector.extract_strided_slice %18 {offsets = [0, 0, 4, 0], sizes = [2, 3, 1, 32], strides = [1, 1, 1, 1]} : vector<2x3x8x32xbf16> to vector<2x3x1x32xbf16>
    %22 = tpu.concatenate %19, %20, %21 in 2 : vector<2x3x1x32xbf16>, vector<2x3x1x32xbf16>, vector<2x3x1x32xbf16> -> vector<2x3x3x32xbf16>
    %23 = vector.extract_strided_slice %18 {offsets = [0, 0, 1, 0], sizes = [2, 3, 1, 32], strides = [1, 1, 1, 1]} : vector<2x3x8x32xbf16> to vector<2x3x1x32xbf16>
    %24 = vector.extract_strided_slice %18 {offsets = [0, 0, 3, 0], sizes = [2, 3, 1, 32], strides = [1, 1, 1, 1]} : vector<2x3x8x32xbf16> to vector<2x3x1x32xbf16>
    %25 = vector.extract_strided_slice %18 {offsets = [0, 0, 5, 0], sizes = [2, 3, 1, 32], strides = [1, 1, 1, 1]} : vector<2x3x8x32xbf16> to vector<2x3x1x32xbf16>
    %26 = tpu.concatenate %23, %24, %25 in 2 : vector<2x3x1x32xbf16>, vector<2x3x1x32xbf16>, vector<2x3x1x32xbf16> -> vector<2x3x3x32xbf16>
    %27 = vector.extract_strided_slice %18 {offsets = [0, 0, 2, 0], sizes = [2, 3, 1, 32], strides = [1, 1, 1, 1]} : vector<2x3x8x32xbf16> to vector<2x3x1x32xbf16>
    %28 = vector.extract_strided_slice %18 {offsets = [0, 0, 4, 0], sizes = [2, 3, 1, 32], strides = [1, 1, 1, 1]} : vector<2x3x8x32xbf16> to vector<2x3x1x32xbf16>
    %29 = vector.extract_strided_slice %18 {offsets = [0, 0, 6, 0], sizes = [2, 3, 1, 32], strides = [1, 1, 1, 1]} : vector<2x3x8x32xbf16> to vector<2x3x1x32xbf16>
    %30 = tpu.concatenate %27, %28, %29 in 2 : vector<2x3x1x32xbf16>, vector<2x3x1x32xbf16>, vector<2x3x1x32xbf16> -> vector<2x3x3x32xbf16>
    %31 = vector.extract_strided_slice %18 {offsets = [0, 0, 3, 0], sizes = [2, 3, 1, 32], strides = [1, 1, 1, 1]} : vector<2x3x8x32xbf16> to vector<2x3x1x32xbf16>
    %32 = vector.extract_strided_slice %18 {offsets = [0, 0, 5, 0], sizes = [2, 3, 1, 32], strides = [1, 1, 1, 1]} : vector<2x3x8x32xbf16> to vector<2x3x1x32xbf16>
    %33 = vector.extract_strided_slice %18 {offsets = [0, 0, 7, 0], sizes = [2, 3, 1, 32], strides = [1, 1, 1, 1]} : vector<2x3x8x32xbf16> to vector<2x3x1x32xbf16>
    %34 = tpu.concatenate %31, %32, %33 in 2 : vector<2x3x1x32xbf16>, vector<2x3x1x32xbf16>, vector<2x3x1x32xbf16> -> vector<2x3x3x32xbf16>
    %35 = vector.extract_strided_slice %14 {offsets = [0, 1, 0, 0], sizes = [2, 1, 8, 32], strides = [1, 1, 1, 1]} : vector<2x8x8x32xbf16> to vector<2x1x8x32xbf16>
    %36 = vector.extract_strided_slice %14 {offsets = [0, 3, 0, 0], sizes = [2, 1, 8, 32], strides = [1, 1, 1, 1]} : vector<2x8x8x32xbf16> to vector<2x1x8x32xbf16>
    %37 = vector.extract_strided_slice %14 {offsets = [0, 5, 0, 0], sizes = [2, 1, 8, 32], strides = [1, 1, 1, 1]} : vector<2x8x8x32xbf16> to vector<2x1x8x32xbf16>
    %38 = tpu.concatenate %35, %36, %37 in 1 : vector<2x1x8x32xbf16>, vector<2x1x8x32xbf16>, vector<2x1x8x32xbf16> -> vector<2x3x8x32xbf16>
    %39 = vector.extract_strided_slice %38 {offsets = [0, 0, 0, 0], sizes = [2, 3, 1, 32], strides = [1, 1, 1, 1]} : vector<2x3x8x32xbf16> to vector<2x3x1x32xbf16>
    %40 = vector.extract_strided_slice %38 {offsets = [0, 0, 2, 0], sizes = [2, 3, 1, 32], strides = [1, 1, 1, 1]} : vector<2x3x8x32xbf16> to vector<2x3x1x32xbf16>
    %41 = vector.extract_strided_slice %38 {offsets = [0, 0, 4, 0], sizes = [2, 3, 1, 32], strides = [1, 1, 1, 1]} : vector<2x3x8x32xbf16> to vector<2x3x1x32xbf16>
    %42 = tpu.concatenate %39, %40, %41 in 2 : vector<2x3x1x32xbf16>, vector<2x3x1x32xbf16>, vector<2x3x1x32xbf16> -> vector<2x3x3x32xbf16>
    %43 = vector.extract_strided_slice %38 {offsets = [0, 0, 1, 0], sizes = [2, 3, 1, 32], strides = [1, 1, 1, 1]} : vector<2x3x8x32xbf16> to vector<2x3x1x32xbf16>
    %44 = vector.extract_strided_slice %38 {offsets = [0, 0, 3, 0], sizes = [2, 3, 1, 32], strides = [1, 1, 1, 1]} : vector<2x3x8x32xbf16> to vector<2x3x1x32xbf16>
    %45 = vector.extract_strided_slice %38 {offsets = [0, 0, 5, 0], sizes = [2, 3, 1, 32], strides = [1, 1, 1, 1]} : vector<2x3x8x32xbf16> to vector<2x3x1x32xbf16>
    %46 = tpu.concatenate %43, %44, %45 in 2 : vector<2x3x1x32xbf16>, vector<2x3x1x32xbf16>, vector<2x3x1x32xbf16> -> vector<2x3x3x32xbf16>
    %47 = vector.extract_strided_slice %38 {offsets = [0, 0, 2, 0], sizes = [2, 3, 1, 32], strides = [1, 1, 1, 1]} : vector<2x3x8x32xbf16> to vector<2x3x1x32xbf16>
    %48 = vector.extract_strided_slice %38 {offsets = [0, 0, 4, 0], sizes = [2, 3, 1, 32], strides = [1, 1, 1, 1]} : vector<2x3x8x32xbf16> to vector<2x3x1x32xbf16>
    %49 = vector.extract_strided_slice %38 {offsets = [0, 0, 6, 0], sizes = [2, 3, 1, 32], strides = [1, 1, 1, 1]} : vector<2x3x8x32xbf16> to vector<2x3x1x32xbf16>
    %50 = tpu.concatenate %47, %48, %49 in 2 : vector<2x3x1x32xbf16>, vector<2x3x1x32xbf16>, vector<2x3x1x32xbf16> -> vector<2x3x3x32xbf16>
    %51 = vector.extract_strided_slice %38 {offsets = [0, 0, 3, 0], sizes = [2, 3, 1, 32], strides = [1, 1, 1, 1]} : vector<2x3x8x32xbf16> to vector<2x3x1x32xbf16>
    %52 = vector.extract_strided_slice %38 {offsets = [0, 0, 5, 0], sizes = [2, 3, 1, 32], strides = [1, 1, 1, 1]} : vector<2x3x8x32xbf16> to vector<2x3x1x32xbf16>
    %53 = vector.extract_strided_slice %38 {offsets = [0, 0, 7, 0], sizes = [2, 3, 1, 32], strides = [1, 1, 1, 1]} : vector<2x3x8x32xbf16> to vector<2x3x1x32xbf16>
    %54 = tpu.concatenate %51, %52, %53 in 2 : vector<2x3x1x32xbf16>, vector<2x3x1x32xbf16>, vector<2x3x1x32xbf16> -> vector<2x3x3x32xbf16>
    %55 = vector.extract_strided_slice %14 {offsets = [0, 2, 0, 0], sizes = [2, 1, 8, 32], strides = [1, 1, 1, 1]} : vector<2x8x8x32xbf16> to vector<2x1x8x32xbf16>
    %56 = vector.extract_strided_slice %14 {offsets = [0, 4, 0, 0], sizes = [2, 1, 8, 32], strides = [1, 1, 1, 1]} : vector<2x8x8x32xbf16> to vector<2x1x8x32xbf16>
    %57 = vector.extract_strided_slice %14 {offsets = [0, 6, 0, 0], sizes = [2, 1, 8, 32], strides = [1, 1, 1, 1]} : vector<2x8x8x32xbf16> to vector<2x1x8x32xbf16>
    %58 = tpu.concatenate %55, %56, %57 in 1 : vector<2x1x8x32xbf16>, vector<2x1x8x32xbf16>, vector<2x1x8x32xbf16> -> vector<2x3x8x32xbf16>
    %59 = vector.extract_strided_slice %58 {offsets = [0, 0, 0, 0], sizes = [2, 3, 1, 32], strides = [1, 1, 1, 1]} : vector<2x3x8x32xbf16> to vector<2x3x1x32xbf16>
    %60 = vector.extract_strided_slice %58 {offsets = [0, 0, 2, 0], sizes = [2, 3, 1, 32], strides = [1, 1, 1, 1]} : vector<2x3x8x32xbf16> to vector<2x3x1x32xbf16>
    %61 = vector.extract_strided_slice %58 {offsets = [0, 0, 4, 0], sizes = [2, 3, 1, 32], strides = [1, 1, 1, 1]} : vector<2x3x8x32xbf16> to vector<2x3x1x32xbf16>
    %62 = tpu.concatenate %59, %60, %61 in 2 : vector<2x3x1x32xbf16>, vector<2x3x1x32xbf16>, vector<2x3x1x32xbf16> -> vector<2x3x3x32xbf16>
    %63 = vector.extract_strided_slice %58 {offsets = [0, 0, 1, 0], sizes = [2, 3, 1, 32], strides = [1, 1, 1, 1]} : vector<2x3x8x32xbf16> to vector<2x3x1x32xbf16>
    %64 = vector.extract_strided_slice %58 {offsets = [0, 0, 3, 0], sizes = [2, 3, 1, 32], strides = [1, 1, 1, 1]} : vector<2x3x8x32xbf16> to vector<2x3x1x32xbf16>
    %65 = vector.extract_strided_slice %58 {offsets = [0, 0, 5, 0], sizes = [2, 3, 1, 32], strides = [1, 1, 1, 1]} : vector<2x3x8x32xbf16> to vector<2x3x1x32xbf16>
    %66 = tpu.concatenate %63, %64, %65 in 2 : vector<2x3x1x32xbf16>, vector<2x3x1x32xbf16>, vector<2x3x1x32xbf16> -> vector<2x3x3x32xbf16>
    %67 = vector.extract_strided_slice %58 {offsets = [0, 0, 2, 0], sizes = [2, 3, 1, 32], strides = [1, 1, 1, 1]} : vector<2x3x8x32xbf16> to vector<2x3x1x32xbf16>
    %68 = vector.extract_strided_slice %58 {offsets = [0, 0, 4, 0], sizes = [2, 3, 1, 32], strides = [1, 1, 1, 1]} : vector<2x3x8x32xbf16> to vector<2x3x1x32xbf16>
    %69 = vector.extract_strided_slice %58 {offsets = [0, 0, 6, 0], sizes = [2, 3, 1, 32], strides = [1, 1, 1, 1]} : vector<2x3x8x32xbf16> to vector<2x3x1x32xbf16>
    %70 = tpu.concatenate %67, %68, %69 in 2 : vector<2x3x1x32xbf16>, vector<2x3x1x32xbf16>, vector<2x3x1x32xbf16> -> vector<2x3x3x32xbf16>
    %71 = vector.extract_strided_slice %58 {offsets = [0, 0, 3, 0], sizes = [2, 3, 1, 32], strides = [1, 1, 1, 1]} : vector<2x3x8x32xbf16> to vector<2x3x1x32xbf16>
    %72 = vector.extract_strided_slice %58 {offsets = [0, 0, 5, 0], sizes = [2, 3, 1, 32], strides = [1, 1, 1, 1]} : vector<2x3x8x32xbf16> to vector<2x3x1x32xbf16>
    %73 = vector.extract_strided_slice %58 {offsets = [0, 0, 7, 0], sizes = [2, 3, 1, 32], strides = [1, 1, 1, 1]} : vector<2x3x8x32xbf16> to vector<2x3x1x32xbf16>
    %74 = tpu.concatenate %71, %72, %73 in 2 : vector<2x3x1x32xbf16>, vector<2x3x1x32xbf16>, vector<2x3x1x32xbf16> -> vector<2x3x3x32xbf16>
    %75 = vector.extract_strided_slice %14 {offsets = [0, 3, 0, 0], sizes = [2, 1, 8, 32], strides = [1, 1, 1, 1]} : vector<2x8x8x32xbf16> to vector<2x1x8x32xbf16>
    %76 = vector.extract_strided_slice %14 {offsets = [0, 5, 0, 0], sizes = [2, 1, 8, 32], strides = [1, 1, 1, 1]} : vector<2x8x8x32xbf16> to vector<2x1x8x32xbf16>
    %77 = vector.extract_strided_slice %14 {offsets = [0, 7, 0, 0], sizes = [2, 1, 8, 32], strides = [1, 1, 1, 1]} : vector<2x8x8x32xbf16> to vector<2x1x8x32xbf16>
    %78 = tpu.concatenate %75, %76, %77 in 1 : vector<2x1x8x32xbf16>, vector<2x1x8x32xbf16>, vector<2x1x8x32xbf16> -> vector<2x3x8x32xbf16>
    %79 = vector.extract_strided_slice %78 {offsets = [0, 0, 0, 0], sizes = [2, 3, 1, 32], strides = [1, 1, 1, 1]} : vector<2x3x8x32xbf16> to vector<2x3x1x32xbf16>
    %80 = vector.extract_strided_slice %78 {offsets = [0, 0, 2, 0], sizes = [2, 3, 1, 32], strides = [1, 1, 1, 1]} : vector<2x3x8x32xbf16> to vector<2x3x1x32xbf16>
    %81 = vector.extract_strided_slice %78 {offsets = [0, 0, 4, 0], sizes = [2, 3, 1, 32], strides = [1, 1, 1, 1]} : vector<2x3x8x32xbf16> to vector<2x3x1x32xbf16>
    %82 = tpu.concatenate %79, %80, %81 in 2 : vector<2x3x1x32xbf16>, vector<2x3x1x32xbf16>, vector<2x3x1x32xbf16> -> vector<2x3x3x32xbf16>
    %83 = vector.extract_strided_slice %78 {offsets = [0, 0, 1, 0], sizes = [2, 3, 1, 32], strides = [1, 1, 1, 1]} : vector<2x3x8x32xbf16> to vector<2x3x1x32xbf16>
    %84 = vector.extract_strided_slice %78 {offsets = [0, 0, 3, 0], sizes = [2, 3, 1, 32], strides = [1, 1, 1, 1]} : vector<2x3x8x32xbf16> to vector<2x3x1x32xbf16>
    %85 = vector.extract_strided_slice %78 {offsets = [0, 0, 5, 0], sizes = [2, 3, 1, 32], strides = [1, 1, 1, 1]} : vector<2x3x8x32xbf16> to vector<2x3x1x32xbf16>
    %86 = tpu.concatenate %83, %84, %85 in 2 : vector<2x3x1x32xbf16>, vector<2x3x1x32xbf16>, vector<2x3x1x32xbf16> -> vector<2x3x3x32xbf16>
    %87 = vector.extract_strided_slice %78 {offsets = [0, 0, 2, 0], sizes = [2, 3, 1, 32], strides = [1, 1, 1, 1]} : vector<2x3x8x32xbf16> to vector<2x3x1x32xbf16>
    %88 = vector.extract_strided_slice %78 {offsets = [0, 0, 4, 0], sizes = [2, 3, 1, 32], strides = [1, 1, 1, 1]} : vector<2x3x8x32xbf16> to vector<2x3x1x32xbf16>
    %89 = vector.extract_strided_slice %78 {offsets = [0, 0, 6, 0], sizes = [2, 3, 1, 32], strides = [1, 1, 1, 1]} : vector<2x3x8x32xbf16> to vector<2x3x1x32xbf16>
    %90 = tpu.concatenate %87, %88, %89 in 2 : vector<2x3x1x32xbf16>, vector<2x3x1x32xbf16>, vector<2x3x1x32xbf16> -> vector<2x3x3x32xbf16>
    %91 = vector.extract_strided_slice %78 {offsets = [0, 0, 3, 0], sizes = [2, 3, 1, 32], strides = [1, 1, 1, 1]} : vector<2x3x8x32xbf16> to vector<2x3x1x32xbf16>
    %92 = vector.extract_strided_slice %78 {offsets = [0, 0, 5, 0], sizes = [2, 3, 1, 32], strides = [1, 1, 1, 1]} : vector<2x3x8x32xbf16> to vector<2x3x1x32xbf16>
    %93 = vector.extract_strided_slice %78 {offsets = [0, 0, 7, 0], sizes = [2, 3, 1, 32], strides = [1, 1, 1, 1]} : vector<2x3x8x32xbf16> to vector<2x3x1x32xbf16>
    %94 = tpu.concatenate %91, %92, %93 in 2 : vector<2x3x1x32xbf16>, vector<2x3x1x32xbf16>, vector<2x3x1x32xbf16> -> vector<2x3x3x32xbf16>
    %95 = tpu.concatenate %22, %26, %30, %34, %42, %46, %50, %54, %62, %66, %70, %74, %82, %86, %90, %94 in 3 : vector<2x3x3x32xbf16>, vector<2x3x3x32xbf16>, vector<2x3x3x32xbf16>, vector<2x3x3x32xbf16>, vector<2x3x3x32xbf16>, vector<2x3x3x32xbf16>, vector<2x3x3x32xbf16>, vector<2x3x3x32xbf16>, vector<2x3x3x32xbf16>, vector<2x3x3x32xbf16>, vector<2x3x3x32xbf16>, vector<2x3x3x32xbf16>, vector<2x3x3x32xbf16>, vector<2x3x3x32xbf16>, vector<2x3x3x32xbf16>, vector<2x3x3x32xbf16> -> vector<2x3x3x512xbf16>
    %cst_19 = arith.constant 0.000000e+00 : bf16
    %96 = vector.broadcast %cst_19 : bf16 to vector<2x3x5x512xbf16>
    %97 = tpu.concatenate %95, %96 in 2 : vector<2x3x3x512xbf16>, vector<2x3x5x512xbf16> -> vector<2x3x8x512xbf16>
    %98 = vector.shape_cast %97 : vector<2x3x8x512xbf16> to vector<48x512xbf16>
    %c0_20 = arith.constant 0 : index
    %c0_21 = arith.constant 0 : index
    %99 = vector.load %arg4[%c0_20, %c0_21] : memref<512x64xbf16, #tpu.memory_space<vmem>>, vector<512x64xbf16>
    %cst_22 = arith.constant dense<0.000000e+00> : vector<48x64xf32>
    %100 = tpu.matmul %98, %99, %cst_22 {dimension_numbers = #tpu.dot_dimension_numbers<[1], [0], [0], [1], [0, 0, 1, 1], [], []>} : vector<48x512xbf16>, vector<512x64xbf16>, vector<48x64xf32> -> vector<48x64xf32>
    %c0_23 = arith.constant 0 : index
    %c0_24 = arith.constant 0 : index
    %101 = vector.load %arg5[%c0_23, %c0_24] : memref<1x64xf32, #tpu.memory_space<vmem>>, vector<1x64xf32>
    %102 = vector.broadcast %101 : vector<1x64xf32> to vector<48x64xf32>
    %103 = arith.addf %100, %102 : vector<48x64xf32>
    %cst_25 = arith.constant 0.000000e+00 : f32
    %104 = vector.broadcast %cst_25 : f32 to vector<48x64xf32>
    %105 = arith.maximumf %103, %104 : vector<48x64xf32>
    %106 = arith.truncf %105 : vector<48x64xf32> to vector<48x64xbf16>
    %107 = vector.shape_cast %106 : vector<48x64xbf16> to vector<2x3x8x64xbf16>
    %108 = vector.extract_strided_slice %107 {offsets = [0, 0, 0, 0], sizes = [2, 1, 1, 64], strides = [1, 1, 1, 1]} : vector<2x3x8x64xbf16> to vector<2x1x1x64xbf16>
    %109 = vector.extract_strided_slice %107 {offsets = [0, 0, 1, 0], sizes = [2, 1, 1, 64], strides = [1, 1, 1, 1]} : vector<2x3x8x64xbf16> to vector<2x1x1x64xbf16>
    %110 = vector.extract_strided_slice %107 {offsets = [0, 0, 2, 0], sizes = [2, 1, 1, 64], strides = [1, 1, 1, 1]} : vector<2x3x8x64xbf16> to vector<2x1x1x64xbf16>
    %111 = vector.extract_strided_slice %107 {offsets = [0, 1, 0, 0], sizes = [2, 1, 1, 64], strides = [1, 1, 1, 1]} : vector<2x3x8x64xbf16> to vector<2x1x1x64xbf16>
    %112 = vector.extract_strided_slice %107 {offsets = [0, 1, 1, 0], sizes = [2, 1, 1, 64], strides = [1, 1, 1, 1]} : vector<2x3x8x64xbf16> to vector<2x1x1x64xbf16>
    %113 = vector.extract_strided_slice %107 {offsets = [0, 1, 2, 0], sizes = [2, 1, 1, 64], strides = [1, 1, 1, 1]} : vector<2x3x8x64xbf16> to vector<2x1x1x64xbf16>
    %114 = vector.extract_strided_slice %107 {offsets = [0, 2, 0, 0], sizes = [2, 1, 1, 64], strides = [1, 1, 1, 1]} : vector<2x3x8x64xbf16> to vector<2x1x1x64xbf16>
    %115 = vector.extract_strided_slice %107 {offsets = [0, 2, 1, 0], sizes = [2, 1, 1, 64], strides = [1, 1, 1, 1]} : vector<2x3x8x64xbf16> to vector<2x1x1x64xbf16>
    %116 = vector.extract_strided_slice %107 {offsets = [0, 2, 2, 0], sizes = [2, 1, 1, 64], strides = [1, 1, 1, 1]} : vector<2x3x8x64xbf16> to vector<2x1x1x64xbf16>
    %117 = tpu.concatenate %108, %109, %110, %111, %112, %113, %114, %115, %116 in 3 : vector<2x1x1x64xbf16>, vector<2x1x1x64xbf16>, vector<2x1x1x64xbf16>, vector<2x1x1x64xbf16>, vector<2x1x1x64xbf16>, vector<2x1x1x64xbf16>, vector<2x1x1x64xbf16>, vector<2x1x1x64xbf16>, vector<2x1x1x64xbf16> -> vector<2x1x1x576xbf16>
    %cst_26 = arith.constant 0.000000e+00 : bf16
    %118 = vector.broadcast %cst_26 : bf16 to vector<2x1x7x576xbf16>
    %119 = tpu.concatenate %117, %118 in 2 : vector<2x1x1x576xbf16>, vector<2x1x7x576xbf16> -> vector<2x1x8x576xbf16>
    %120 = vector.shape_cast %119 : vector<2x1x8x576xbf16> to vector<16x576xbf16>
    %c0_27 = arith.constant 0 : index
    %c0_28 = arith.constant 0 : index
    %121 = vector.load %arg6[%c0_27, %c0_28] : memref<576x128xbf16, #tpu.memory_space<vmem>>, vector<576x128xbf16>
    %cst_29 = arith.constant dense<0.000000e+00> : vector<16x128xf32>
    %122 = tpu.matmul %120, %121, %cst_29 {dimension_numbers = #tpu.dot_dimension_numbers<[1], [0], [0], [1], [0, 0, 1, 1], [], []>} : vector<16x576xbf16>, vector<576x128xbf16>, vector<16x128xf32> -> vector<16x128xf32>
    %c0_30 = arith.constant 0 : index
    %c0_31 = arith.constant 0 : index
    %123 = vector.load %arg7[%c0_30, %c0_31] : memref<1x128xf32, #tpu.memory_space<vmem>>, vector<1x128xf32>
    %124 = vector.broadcast %123 : vector<1x128xf32> to vector<16x128xf32>
    %125 = arith.addf %122, %124 : vector<16x128xf32>
    %cst_32 = arith.constant 0.000000e+00 : f32
    %126 = vector.broadcast %cst_32 : f32 to vector<16x128xf32>
    %127 = arith.maximumf %125, %126 : vector<16x128xf32>
    %128 = vector.shape_cast %127 : vector<16x128xf32> to vector<2x1x8x128xf32>
    %c0_33 = arith.constant 0 : index
    %c0_34 = arith.constant 0 : index
    %c0_35 = arith.constant 0 : index
    %c0_36 = arith.constant 0 : index
    %129 = vector.load %arg8[%c0_33, %c0_34, %c0_35, %c0_36] : memref<2x1x8x128xf32, #tpu.memory_space<vmem>>, vector<2x1x8x128xf32>
    tpu.vector_store %arg8[%c0_33, %c0_34, %c0_35, %c0_36], %128 {strides = array<i32>} : memref<2x1x8x128xf32, #tpu.memory_space<vmem>>, vector<2x1x8x128xf32>,
    return
  }
  func.func @transform_0(%arg0: i32) -> (i32, i32, i32, i32) {
    %c0_i32 = arith.constant 0 : i32
    %c0_i32_0 = arith.constant 0 : i32
    %c0_i32_1 = arith.constant 0 : i32
    %c0_i32_2 = arith.constant 0 : i32
    return %arg0, %c0_i32, %c0_i32_0, %c0_i32_1 : i32, i32, i32, i32
  }
  func.func @transform_1(%arg0: i32) -> (i32, i32) {
    %c0_i32 = arith.constant 0 : i32
    %c0_i32_0 = arith.constant 0 : i32
    %c0_i32_1 = arith.constant 0 : i32
    return %c0_i32, %c0_i32_0 : i32, i32
  }
  func.func @transform_2(%arg0: i32) -> (i32, i32) {
    %c0_i32 = arith.constant 0 : i32
    %c0_i32_0 = arith.constant 0 : i32
    %c0_i32_1 = arith.constant 0 : i32
    return %c0_i32, %c0_i32_0 : i32, i32
  }
  func.func @transform_3(%arg0: i32) -> (i32, i32) {
    %c0_i32 = arith.constant 0 : i32
    %c0_i32_0 = arith.constant 0 : i32
    %c0_i32_1 = arith.constant 0 : i32
    return %c0_i32, %c0_i32_0 : i32, i32
  }
  func.func @transform_4(%arg0: i32) -> (i32, i32) {
    %c0_i32 = arith.constant 0 : i32
    %c0_i32_0 = arith.constant 0 : i32
    %c0_i32_1 = arith.constant 0 : i32
    return %c0_i32, %c0_i32_0 : i32, i32
  }
  func.func @transform_5(%arg0: i32) -> (i32, i32) {
    %c0_i32 = arith.constant 0 : i32
    %c0_i32_0 = arith.constant 0 : i32
    %c0_i32_1 = arith.constant 0 : i32
    return %c0_i32, %c0_i32_0 : i32, i32
  }
  func.func @transform_6(%arg0: i32) -> (i32, i32) {
    %c0_i32 = arith.constant 0 : i32
    %c0_i32_0 = arith.constant 0 : i32
    %c0_i32_1 = arith.constant 0 : i32
    return %c0_i32, %c0_i32_0 : i32, i32
  }
  func.func @transform_7(%arg0: i32) -> (i32, i32, i32, i32) {
    %c0_i32 = arith.constant 0 : i32
    %c0_i32_0 = arith.constant 0 : i32
    %c0_i32_1 = arith.constant 0 : i32
    %c0_i32_2 = arith.constant 0 : i32
    return %arg0, %c0_i32, %c0_i32_0, %c0_i32_1 : i32, i32, i32, i32
  }
}

</mosaic_0001>

<bundles_post_ra>
// kernel: _lambda_.1
= control target key start
LH: loop header
LB: loop body
LE: loop exit
PB: predicated region body
PF: predicated region fallthrough
CT: control target
= control target key end

     0   :  { %s3776_s24 = smov 0   ;;  %s5183_s0 = inlined_call_operand.vmem [shape: bf16[4,9,9,64], index: 0, kind: input, shape index: {}]   ;;  %s5184_s1 = inlined_call_operand.vmem [shape: bf16[256,32], index: 1, kind: input, shape index: {}]   ;;  %s5185_s2 = inlined_call_operand.vmem [shape: f32[1,32], index: 2, kind: input, shape index: {}]   ;;  %s5186_s3 = inlined_call_operand.vmem [shape: bf16[512,64], index: 3, kind: input, shape index: {}]   ;;  %s5187_s4 = inlined_call_operand.vmem [shape: f32[1,64], index: 4, kind: input, shape index: {}]   ;;  %s5188_s5 = inlined_call_operand.vmem [shape: bf16[576,128], index: 5, kind: input, shape index: {}]   ;;  %s5189_s6 = inlined_call_operand.vmem [shape: f32[1,128], index: 6, kind: input, shape index: {}]   ;;  %s5190_s7 = inlined_call_operand.vmem [shape: f32[4,1,8,128], index: 7, kind: output, shape index: {}]  }
   0x1 LB: > { %s3160_s25 = sadd.s32 4294967295, %s3729_s24   ;;  %p3164_p0 = scmp.ge.s32.totalorder %s3729_s24, 1  ;;  %s3729_s24 = sphi %s3776_s24, %s17_s24  }
   0x2   : > { %p239_p1 = scmp.lt.s32.totalorder %s3729_s24, 3 }
   0x4   : > { %p240_p2 = pnand %p3164_p0, %p239_p1 }
   0x6   : > { %243 = sbr.rel (%p240_p2) target bundleno = 1121 (0x461), region = 48 }
   0xb   : > { %s3165_s26 = sshll.u32 %s3160_s25, 1  ;;  %v3639_v0 = vld [vmem:[%s5184_s1 + $0x78] sm:$0xff]   ;;  %v3641_v2 = vld [vmem:[%s5184_s1 + $0x70] sm:$0xff]   ;;  %v3643_v4 = vld [vmem:[%s5184_s1 + $0x68] sm:$0xff]   ;;  %s3731_s28 = smov 64   ;;  %vm799_vm0 = vcmask 523264  }
   0xc   : > { %p273_p3 = scmp.lt.s32.totalorder %s3165_s26, 3  ;;  %v3640_v1 = vld [vmem:[%s5184_s1 + $0x38] sm:$0xff]   ;;  %3400 = vmatprep.subr.bf16.mxu0 %v3639_v0  ;;  %v3642_v3 = vld [vmem:[%s5184_s1 + $0x30] sm:$0xff]   ;;  %v3644_v5 = vld [vmem:[%s5184_s1 + $0x28] sm:$0xff]   ;;  %vm1340_vm1 = vcmask 1040384   ;;  %s3732_s18 = smov 32  }
   0xd   : > { %3401 = vmatpush3.bf16.msra.mxu0 %v3640_v1  ;;  %v3645_v6 = vld [vmem:[%s5184_s1 + $0x60] sm:$0xff]   ;;  %v3647_v45 = vld [vmem:[%s5184_s1 + $0x58] sm:$0xff]   ;;  %v3649_v0 = vld [vmem:[%s5184_s1 + $0x50] sm:$0xff]   ;;  %vm1341_vm2 = vsmask.f32 256  ;;  %s3733_s27 = smov 96  }
   0xe   : > { %s5242_s26 = smov (!%p273_p3, %s3165_s26), 3  ;;  %3402 = vmatprep.subr.bf16.mxu0 %v3641_v2  ;;  %v3646_v34 = vld [vmem:[%s5184_s1 + $0x20] sm:$0xff]   ;;  %v3648_v57 = vld [vmem:[%s5184_s1 + $0x18] sm:$0xff]   ;;  %vm4186_vm3 = vmand %vm1340_vm1, %vm1341_vm2  ;;  %vm1980_vm4 = vcmask 261120   ;;  %vm2005_vm5 = vcmask 785408   ;;  %vm2094_vm6 = vcmask 1041408  }
   0xf   : > { %s3593_s12 = smul.u32 72, %s5242_s26  ;;  %vm2095_vm7 = vsmask.f32 1280  ;;  %vm3735_vm9 = vmmov 0   ;;  %s3168_s23 = sshll.u32 %s5242_s26, 3 }
  0x10   : > { %vm4833_vm8 = vmand %vm2094_vm6, %vm2095_vm7  ;;  %s283_s29 = scalar_lea.vmem %s5190_s7, %s3168_s23 }
  0x11   : > { %s3808_s19 = scalar_lea.vmem %s5183_s0, %s3593_s12  ;;  %3403 = vmatpush3.bf16.msra.mxu0 %v3642_v3 }
  0x12   : > { %v3814_v7 = vld [vmem:[%s3808_s19 + $0x8] sm:$0xf]  ;;  %v3185_v8 = vld [vmem:[%s3808_s19 + $0xc] sm:$0x1]  ;;  %v3818_v9 = vld [vmem:[%s3808_s19] sm:$0xf]  ;;  %3404 = vmatprep.subr.bf16.mxu0 %v3643_v4 }
  0x13   : > { %v3217_v10 = vcombine.low %v3814_v7, %v3185_v8  ;;  %v302_v11 = vld [vmem:[%s3808_s19 + $0x4] sm:$0x1]  ;;  %v3823_v12 = vld [vmem:[%s3808_s19 + $0x10] sm:$0xf]  ;;  %v3186_v13 = vld [vmem:[%s3808_s19 + $0x14] sm:$0x1] }
  0x14   : > { %v3201_v14 = vcombine.low %v3818_v9, %v302_v11  ;;  %v3218_v15 = vcombine.low %v3823_v12, %v3186_v13  ;;  %v3829_v16 = vld [vmem:[%s3808_s19 + $0x8] sm:$0xf]  ;;  %v303_v17 = vld [vmem:[%s3808_s19 + $0xc] sm:$0x1]  ;;  %v3833_v18 = vld [vmem:[%s3808_s19 + $0x18] sm:$0xf] }
  0x15   : > { %v656_v19 = vshrl.u32 %v3217_v10, 16  ;;  %v658_v20 = vshll.u32 %v3217_v10, 16  ;;  %v3202_v21 = vcombine.low %v3829_v16, %v303_v17  ;;  %v3187_v22 = vld [vmem:[%s3808_s19 + $0x1c] sm:$0x1]  ;;  %v3838_v23 = vld [vmem:[%s3808_s19 + $0x20] sm:$0xf]  ;;  %3405 = vmatpush3.bf16.msra.mxu0 %v3644_v5 }
  0x16   : > { %v432_v24 = vshrl.u32 %v3201_v14, 16  ;;  %v434_v25 = vshll.u32 %v3201_v14, 16  ;;  %v663_v26 = vshrl.u32 %v3218_v15, 16  ;;  %v665_v27 = vshll.u32 %v3218_v15, 16  ;;  %v3188_v28 = vld [vmem:[%s3808_s19 + $0x24] sm:$0x1]  ;;  %3406 = vmatprep.subr.bf16.mxu0 %v3645_v6 }
  0x17   : > { %v660_v29 = vrot.slane %v658_v20, 1  ;;  %v439_v30 = vshrl.u32 %v3202_v21, 16  ;;  %v441_v31 = vshll.u32 %v3202_v21, 16  ;;  %v3219_v32 = vcombine.low %v3833_v18, %v3187_v22  ;;  %v3843_v33 = vld [vmem:[%s3808_s19 + $0x10] sm:$0xf]  ;;  %v3651_v17 = vld [vmem:[%s5184_s1 + $0x48] sm:$0xff]  }
  0x18   : > { %v436_v35 = vrot.slane %v434_v25, 1  ;;  %v667_v36 = vrot.slane %v665_v27, 1  ;;  %v3220_v37 = vcombine.low %v3838_v23, %v3188_v28  ;;  %v304_v38 = vld [vmem:[%s3808_s19 + $0x14] sm:$0x1]  ;;  %v3851_v39 = vld [vmem:[%s3808_s19 + $0x18] sm:$0xf] }
  0x19   : > { %v661_v40 = vor.u32 %v660_v29, %v656_v19  ;;  %v443_v41 = vrot.slane %v441_v31, 1  ;;  %v670_v42 = vshrl.u32 %v3219_v32, 16  ;;  %v672_v43 = vshll.u32 %v3219_v32, 16  ;;  %v305_v44 = vld [vmem:[%s3808_s19 + $0x1c] sm:$0x1]  ;;  %3407 = vmatpush3.bf16.msra.mxu0 %v3646_v34  ;;  %v3650_v10 = vld [vmem:[%s5184_s1 + $0x10] sm:$0xff]  }
  0x1a   : > { %v437_v46 = vor.u32 %v436_v35, %v432_v24  ;;  %v677_v47 = vshrl.u32 %v3220_v37, 16  ;;  %v679_v48 = vshll.u32 %v3220_v37, 16  ;;  %v3858_v49 = vld [vmem:[%s3808_s19 + $0x28] sm:$0xf]  ;;  %v3189_v50 = vld [vmem:[%s3808_s19 + $0x2c] sm:$0x1]  ;;  %v668_v51 = vor.u32 %v667_v36, %v663_v26  ;;  %3408 = vmatprep.subr.bf16.mxu0 %v3647_v45 }
  0x1b   : > { %767 = vrot.lane.b32.xlu0 %v661_v40, %s3731_s28  ;;  %v674_v52 = vrot.slane %v672_v43, 1  ;;  %v3203_v53 = vcombine.low %v3843_v33, %v304_v38  ;;  %v3204_v54 = vcombine.low %v3851_v39, %v305_v44  ;;  %v3865_v55 = vld [vmem:[%s3808_s19 + $0x30] sm:$0xf]  ;;  %v3190_v56 = vld [vmem:[%s3808_s19 + $0x34] sm:$0x1]  ;;  %v444_v58 = vor.u32 %v443_v41, %v439_v30  ;;  %v3652_v29 = vld [vmem:[%s5184_s1 + $0x8] sm:$0xff]  }
  0x1c   : > { %543 = vrot.lane.b32.xlu1 %v437_v46, %s3731_s28  ;;  %v681_v59 = vrot.slane %v679_v48, 1  ;;  %v3221_v60 = vcombine.low %v3858_v49, %v3189_v50  ;;  %v3874_v61 = vcombine.low %v3865_v55, %v3190_v56  ;;  %v3877_v62 = vld [vmem:[%s3808_s19 + $0x20] sm:$0xf]  ;;  %v306_v63 = vld [vmem:[%s3808_s19 + $0x24] sm:$0x1] }
  0x1d   : > { %v448_v1 = vshll.u32 %v3203_v53, 16  ;;  %v3884_v2 = vld [vmem:[%s3808_s19 + $0x28] sm:$0xf]  ;;  %v675_v3 = vor.u32 %v674_v52, %v670_v42  ;;  %v446_v4 = vshrl.u32 %v3203_v53, 16  ;;  %v455_v5 = vshll.u32 %v3204_v54, 16  ;;  %3409 = vmatpush3.bf16.msra.mxu0 %v3648_v57  ;;  %v3653_v41 = vld [vmem:[%s5184_s1 + $0x40] sm:$0xff]  }
  0x1e   : > { %v686_v6 = vshll.u32 %v3221_v60, 16  ;;  %v307_v8 = vld [vmem:[%s3808_s19 + $0x2c] sm:$0x1]  ;;  %v453_v13 = vshrl.u32 %v3204_v54, 16  ;;  %v684_v14 = vshrl.u32 %v3221_v60, 16  ;;  %v3892_v15 = vcombine.low %v3877_v62, %v306_v63  ;;  %3410 = vmatprep.subr.bf16.mxu0 %v3649_v0  ;;  %v3654_v57 = vld [vmem:[%s5184_s1] sm:$0xff]  }
  0x1f   : > { %769 = vrot.lane.b32.xlu0 %v668_v51, %s3731_s28  ;;  %v450_v11 = vrot.slane %v448_v1, 1  ;;  %v682_v19 = vor.u32 %v681_v59, %v677_v47  ;;  %v457_v20 = vrot.slane %v455_v5, 1  ;;  %v693_v21 = vshll.u32 %v3874_v61, 16  ;;  %v3903_v24 = vld [vmem:[%s3808_s19 + $0x38] sm:$0xf] }
  0x20   : > { %545 = vrot.lane.b32.xlu1 %v444_v58, %s3731_s28  ;;  %v3900_v22 = vcombine.low %v3884_v2, %v307_v8  ;;  %v3191_v25 = vld [vmem:[%s3808_s19 + $0x3c] sm:$0x1]  ;;  %v691_v26 = vshrl.u32 %v3874_v61, 16  ;;  %v3908_v27 = vld [vmem:[%s3808_s19 + $0x40] sm:$0xf]  ;;  %v688_v30 = vrot.slane %v686_v6, 1 }
  0x21   : > { %v3192_v28 = vld [vmem:[%s3808_s19 + $0x44] sm:$0x1]  ;;  %v462_v31 = vshll.u32 %v3892_v15, 16  ;;  %v3916_v32 = vld [vmem:[%s3808_s19 + $0x30] sm:$0xf]  ;;  %3411 = vmatpush3.bf16.msra.mxu0 %v3650_v10  ;;  %v451_v35 = vor.u32 %v450_v11, %v446_v4  ;;  %v3223_v37 = vcombine.low %v3903_v24, %v3191_v25  ;;  %v458_v42 = vor.u32 %v457_v20, %v453_v13 }
  0x22   : > { %v308_v34 = vld [vmem:[%s3808_s19 + $0x34] sm:$0x1]  ;;  %v469_v36 = vshll.u32 %v3900_v22, 16  ;;  %v3923_v38 = vld [vmem:[%s3808_s19 + $0x38] sm:$0xf]  ;;  %3412 = vmatprep.subr.bf16.mxu0 %v3651_v17  ;;  %v695_v43 = vrot.slane %v693_v21, 1  ;;  %v3931_v44 = vcombine.low %v3908_v27, %v3192_v28  ;;  %v689_v52 = vor.u32 %v688_v30, %v684_v14 }
  0x23   : > { %771 = vrot.lane.b32.xlu0 %v675_v3, %s3731_s28  ;;  %v309_v40 = vld [vmem:[%s3808_s19 + $0x3c] sm:$0x1]  ;;  %v3934_v45 = vcombine.low %v3916_v32, %v308_v34  ;;  %v3937_v46 = vld [vmem:[%s3808_s19 + $0x50] sm:$0xf]  ;;  %v3193_v47 = vld [vmem:[%s3808_s19 + $0x54] sm:$0x1] }
  0x24   : > { %773 = vrot.lane.b32.xlu1 %v682_v19, %s3731_s28  ;;  %v700_v48 = vshll.u32 %v3223_v37, 16  ;;  %v3941_v50 = vcombine.low %v3923_v38, %v309_v40  ;;  %v3944_v51 = vld [vmem:[%s3808_s19 + $0x58] sm:$0xf]  ;;  %v460_v53 = vshrl.u32 %v3892_v15, 16  ;;  %v467_v54 = vshrl.u32 %v3900_v22, 16 }
  0x25   : > { %v3194_v56 = vld [vmem:[%s3808_s19 + $0x5c] sm:$0x1]  ;;  %3413 = vmatpush3.bf16.msra.mxu0 %v3652_v29  ;;  %v464_v58 = vrot.slane %v462_v31, 1  ;;  %v471_v59 = vrot.slane %v469_v36, 1  ;;  %v698_v60 = vshrl.u32 %v3223_v37, 16  ;;  %v3225_v61 = vcombine.low %v3937_v46, %v3193_v47 }
  0x26   : > { %3414 = vmatprep.subr.bf16.mxu0 %v3653_v41  ;;  %v696_v63 = vor.u32 %v695_v43, %v691_v26  ;;  %v707_v0 = vshll.u32 %v3931_v44, 16  ;;  %v476_v1 = vshll.u32 %v3934_v45, 16  ;;  %v3958_v3 = vcombine.low %v3944_v51, %v3194_v56  ;;  %v3961_v4 = vld [vmem:[%s3808_s19 + $0x48] sm:$0xf]  ;;  %v310_v5 = vld [vmem:[%s3808_s19 + $0x4c] sm:$0x1] }
  0x27   : > { %547 = vrot.lane.b32.xlu0 %v451_v35, %s3731_s28  ;;  %v702_v6 = vrot.slane %v700_v48, 1  ;;  %v705_v8 = vshrl.u32 %v3931_v44, 16  ;;  %v483_v10 = vshll.u32 %v3941_v50, 16  ;;  %v714_v11 = vshll.u32 %v3225_v61, 16  ;;  %v3967_v13 = vld [vmem:[%s3808_s19 + $0x50] sm:$0xf] }
  0x28   : > { %549 = vrot.lane.b32.xlu1 %v458_v42, %s3731_s28  ;;  %v311_v14 = vld [vmem:[%s3808_s19 + $0x54] sm:$0x1]  ;;  %v3971_v15 = vld [vmem:[%s3808_s19 + $0x60] sm:$0xf]  ;;  %v3195_v17 = vld [vmem:[%s3808_s19 + $0x64] sm:$0x1]  ;;  %v465_v19 = vor.u32 %v464_v58, %v460_v53  ;;  %v3978_v22 = vcombine.low %v3961_v4, %v310_v5  ;;  %v472_v28 = vor.u32 %v471_v59, %v467_v54 }
  0x29   : > { %3415 = vmatpush3.bf16.msra.mxu0 %v3654_v57  ;;  %v474_v20 = vshrl.u32 %v3934_v45, 16  ;;  %v721_v21 = vshll.u32 %v3958_v3, 16  ;;  %v3981_v25 = vld [vmem:[%s3808_s19 + $0x68] sm:$0xf]  ;;  %v3196_v26 = vld [vmem:[%s3808_s19 + $0x6c] sm:$0x1]  ;;  %v3991_v36 = vcombine.low %v3967_v13, %v311_v14  ;;  %v3994_v37 = vcombine.low %v3971_v15, %v3195_v17 }
  0x2a   : > { %v709_v29 = vrot.slane %v707_v0, 1  ;;  %v478_v30 = vrot.slane %v476_v1, 1  ;;  %v3986_v31 = vld [vmem:[%s3808_s19 + $0x58] sm:$0xf]  ;;  %v312_v34 = vld [vmem:[%s3808_s19 + $0x5c] sm:$0x1]  ;;  %v3997_v40 = vcombine.low %v3981_v25, %v3196_v26  ;;  %v703_v42 = vor.u32 %v702_v6, %v698_v60 }
  0x2b   : > { %775 = vrot.lane.b32.xlu0 %v689_v52, %s3731_s28  ;;  %5209 = vst [vmem:[#allocation2_spill] sm:$0xff] %v3986_v31  ;;  %v481_v35 = vshrl.u32 %v3941_v50, 16  ;;  %v4000_v41 = vld [vmem:[%s3808_s19 + $0x60] sm:$0xf]  ;;  %v485_v43 = vrot.slane %v483_v10, 1  ;;  %v712_v44 = vshrl.u32 %v3225_v61, 16  ;;  %v4007_v53 = vcombine.low %v3986_v31, %v312_v34 }
  0x2c   : > { %777 = vrot.lane.b32.xlu1 %v696_v63, %s3731_s28  ;;  %5210 = vst [vmem:[#allocation3_spill] sm:$0xff] %v4000_v41  ;;  %v716_v45 = vrot.slane %v714_v11, 1  ;;  %v313_v47 = vld [vmem:[%s3808_s19 + $0x64] sm:$0x1]  ;;  %v719_v48 = vshrl.u32 %v3958_v3, 16  ;;  %v723_v50 = vrot.slane %v721_v21, 1  ;;  %v710_v54 = vor.u32 %v709_v29, %v705_v8 }
  0x2d   : > { %v490_v52 = vshll.u32 %v3978_v22, 16  ;;  %v479_v56 = vor.u32 %v478_v30, %v474_v20  ;;  %v4011_v57 = vcombine.low %v4000_v41, %v313_v47  ;;  %v4014_v58 = vld [vmem:[%s3808_s19 + $0x70] sm:$0xf]  ;;  %v3197_v59 = vld [vmem:[%s3808_s19 + $0x74] sm:$0x1]  ;;  %v488_v61 = vshrl.u32 %v3978_v22, 16 }
  0x2e   : > { %5211 = vst [vmem:[#allocation4_spill] sm:$0xff] %v4014_v58  ;;  %v4018_v60 = vld [vmem:[%s3808_s19 + $0x78] sm:$0xf]  ;;  %v497_v63 = vshll.u32 %v3991_v36, 16  ;;  %v728_v0 = vshll.u32 %v3994_v37, 16  ;;  %v735_v1 = vshll.u32 %v3997_v40, 16  ;;  %v486_v5 = vor.u32 %v485_v43, %v481_v35 }
  0x2f   : > { %551 = vrot.lane.b32.xlu0 %v465_v19, %s3731_s28  ;;  %5212 = vst [vmem:[#allocation5_spill] sm:$0xff] %v4018_v60  ;;  %v3198_v3 = vld [vmem:[%s3808_s19 + $0x7c] sm:$0x1]  ;;  %v717_v6 = vor.u32 %v716_v45, %v712_v44  ;;  %v504_v8 = vshll.u32 %v4007_v53, 16  ;;  %v511_v10 = vshll.u32 %v4011_v57, 16  ;;  %v495_v17 = vshrl.u32 %v3991_v36, 16 }
  0x30   : > { %553 = vrot.lane.b32.xlu1 %v472_v28, %s3731_s28  ;;  %v4028_v11 = vld [vmem:[%s3808_s19 + $0x68] sm:$0xf]  ;;  %v314_v14 = vld [vmem:[%s3808_s19 + $0x6c] sm:$0x1]  ;;  %v726_v19 = vshrl.u32 %v3994_v37, 16  ;;  %v4035_v20 = vcombine.low %v4014_v58, %v3197_v59  ;;  %v4038_v21 = vcombine.low %v4018_v60, %v3198_v3  ;;  %v492_v28 = vrot.slane %v490_v52, 1 }
  0x31   : > { %5213 = vst [vmem:[#allocation6_spill] sm:$0xff] %v4028_v11  ;;  %v4041_v22 = vld [vmem:[%s3808_s19 + $0x70] sm:$0xf]  ;;  %v315_v26 = vld [vmem:[%s3808_s19 + $0x74] sm:$0x1]  ;;  %v733_v29 = vshrl.u32 %v3997_v40, 16  ;;  %v4047_v30 = vcombine.low %v4028_v11, %v314_v14  ;;  %v724_v3 = vor.u32 %v723_v50, %v719_v48 }
  0x32   : > { %5214 = vst [vmem:[#allocation7_spill] sm:$0xff] %v4041_v22  ;;  %v4050_v34 = vcombine.low %v4041_v22, %v315_v26  ;;  %v4053_v35 = vld [vmem:[%s3808_s19 + $0x80] sm:$0xf]  ;;  %v3199_v36 = vld [vmem:[%s3808_s19 + $0x84] sm:$0x1]  ;;  %v499_v37 = vrot.slane %v497_v63, 1  ;;  %v493_v58 = vor.u32 %v492_v28, %v488_v61 }
  0x33   : > { %779 = vrot.lane.b32.xlu0 %v703_v42, %s3731_s28  ;;  %5215 = vst [vmem:[#allocation8_spill] sm:$0xff] %v4053_v35  ;;  %v730_v42 = vrot.slane %v728_v0, 1  ;;  %v737_v43 = vrot.slane %v735_v1, 1  ;;  %v502_v44 = vshrl.u32 %v4007_v53, 16  ;;  %v4058_v45 = vld [vmem:[%s3808_s19 + $0x88] sm:$0xf]  ;;  %v3231_v1 = vcombine.low %v4053_v35, %v3199_v36 }
  0x34   : > { %781 = vrot.lane.b32.xlu1 %v710_v54, %s3731_s28  ;;  %5216 = vst [vmem:[#allocation9_spill] sm:$0xff] %v4058_v45  ;;  %v506_v40 = vrot.slane %v504_v8, 1  ;;  %v509_v47 = vshrl.u32 %v4011_v57, 16  ;;  %v513_v52 = vrot.slane %v511_v10, 1  ;;  %v742_v54 = vshll.u32 %v4035_v20, 16 }
  0x35   : > { %v3200_v59 = vld [vmem:[%s3808_s19 + $0x8c] sm:$0x1]  ;;  %v749_v63 = vshll.u32 %v4038_v21, 16  ;;  %v518_v0 = vshll.u32 %v4047_v30, 16  ;;  %v525_v53 = vshll.u32 %v4050_v34, 16  ;;  %v747_v26 = vshrl.u32 %v4038_v21, 16 }
  0x36   : > { %v3232_v57 = vcombine.low %v4058_v45, %v3200_v59  ;;  %v4071_v8 = vld [vmem:[%s3808_s19 + $0x78] sm:$0xf]  ;;  %v316_v10 = vld [vmem:[%s3808_s19 + $0x7c] sm:$0x1]  ;;  %v4075_v14 = vld [vmem:[%s3808_s19 + $0x80] sm:$0xf] }
  0x37   : > { %555 = vrot.lane.b32.xlu0 %v479_v56, %s3731_s28  ;;  %5217 = vst [vmem:[#allocation10_spill] sm:$0xff] %v4075_v14  ;;  %v740_v56 = vshrl.u32 %v4035_v20, 16  ;;  %v516_v22 = vshrl.u32 %v4047_v30, 16  ;;  %v756_v11 = vshll.u32 %v3231_v1, 16  ;;  %v317_v60 = vld [vmem:[%s3808_s19 + $0x84] sm:$0x1]  ;;  %v500_v20 = vor.u32 %v499_v37, %v495_v17 }
  0x38   : > { %557 = vrot.lane.b32.xlu1 %v486_v5, %s3731_s28  ;;  %v744_v36 = vrot.slane %v742_v54, 1  ;;  %v763_v35 = vshll.u32 %v3232_v57, 16  ;;  %v751_v48 = vrot.slane %v749_v63, 1  ;;  %v523_v50 = vshrl.u32 %v4050_v34, 16 }
  0x39   : > { %v3215_v5 = vcombine.low %v4071_v8, %v316_v10  ;;  %v3216_v59 = vcombine.low %v4075_v14, %v317_v60  ;;  %v520_v21 = vrot.slane %v518_v0, 1  ;;  %v527_v45 = vrot.slane %v525_v53, 1 }
  0x3a   : > { %v754_v30 = vshrl.u32 %v3231_v1, 16  ;;  %v758_v41 = vrot.slane %v756_v11, 1  ;;  %v761_v31 = vshrl.u32 %v3232_v57, 16  ;;  %v765_v28 = vrot.slane %v763_v35, 1 }
  0x3b   : > { %783 = vrot.lane.b32.xlu0 %v717_v6, %s3731_s28  ;;  %v532_v61 = vshll.u32 %v3215_v5, 16  ;;  %v539_v54 = vshll.u32 %v3216_v59, 16  ;;  %v731_v6 = vor.u32 %v730_v42, %v726_v19  ;;  %v530_v63 = vshrl.u32 %v3215_v5, 16 }
  0x3c   : > { %785 = vrot.lane.b32.xlu1 %v724_v3, %s3731_s28  ;;  %v537_v34 = vshrl.u32 %v3216_v59, 16  ;;  %v738_v10 = vor.u32 %v737_v43, %v733_v29  ;;  %v507_v17 = vor.u32 %v506_v40, %v502_v44  ;;  %v514_v11 = vor.u32 %v513_v52, %v509_v47 }
  0x3d   : > { %v534_v60 = vrot.slane %v532_v61, 1  ;;  %v541_v14 = vrot.slane %v539_v54, 1  ;;  %v745_v35 = vor.u32 %v744_v36, %v740_v56  ;;  %v521_v19 = vor.u32 %v520_v21, %v516_v22 }
  0x3e   : > { %v528_v29 = vor.u32 %v527_v45, %v523_v50  ;;  %v759_v37 = vor.u32 %v758_v41, %v754_v30  ;;  %v766_v42 = vor.u32 %v765_v28, %v761_v31 }
  0x3f   : > { %559 = vrot.lane.b32.xlu0 %v493_v58, %s3731_s28  ;;  %v752_v58 = vor.u32 %v751_v48, %v747_v26  ;;  %v535_v43 = vor.u32 %v534_v60, %v530_v63  ;;  %v542_v44 = vor.u32 %v541_v14, %v537_v34 }
  0x40   : > { %561 = vrot.lane.b32.xlu1 %v500_v20, %s3731_s28 }
  0x43   : > { %787 = vrot.lane.b32.xlu0 %v731_v6, %s3731_s28 }
  0x44   : > { %789 = vrot.lane.b32.xlu1 %v738_v10, %s3731_s28 }
  0x47   : > { %563 = vrot.lane.b32.xlu0 %v507_v17, %s3731_s28 }
  0x48   : > { %565 = vrot.lane.b32.xlu1 %v514_v11, %s3731_s28 }
  0x4b   : > { %791 = vrot.lane.b32.xlu0 %v745_v35, %s3731_s28 }
  0x4c   : > { %793 = vrot.lane.b32.xlu1 %v752_v58, %s3731_s28 }
  0x4f   : > { %567 = vrot.lane.b32.xlu0 %v521_v19, %s3731_s28 }
  0x50   : > { %569 = vrot.lane.b32.xlu1 %v528_v29, %s3731_s28 }
  0x53   : > { %795 = vrot.lane.b32.xlu0 %v759_v37, %s3731_s28 }
  0x54   : > { %797 = vrot.lane.b32.xlu1 %v766_v42, %s3731_s28  ;;  %v5218_v42 = vld [vmem:[#allocation2_spill] sm:$0xff] }
  0x57   : > { %571 = vrot.lane.b32.xlu0 %v535_v43, %s3731_s28 }
  0x58   : > { %573 = vrot.lane.b32.xlu1 %v542_v44, %s3731_s28  ;;  %v5219_v44 = vld [vmem:[#allocation3_spill] sm:$0xff] }
  0x8d   : > { %v768_v22 = vpop.permute.xlu0 %767 }
  0x8e   : > { %v544_v40 = vpop.permute.xlu1 %543  ;;  %v850_v41 = vsel %vm799_vm0, %v3814_v7, %v768_v22 }
  0x8f   : > { %v802_v52 = vsel %vm799_vm0, %v3818_v9, %v544_v40 }
  0x91   : > { %v770_v45 = vpop.permute.xlu0 %769 }
  0x92   : > { %v546_v47 = vpop.permute.xlu1 %545  ;;  %v853_v31 = vsel %vm799_vm0, %v3823_v12, %v770_v45  ;;  %v5220_v45 = vld [vmem:[#allocation4_spill] sm:$0xff] }
  0x93   : > { %v805_v0 = vsel %vm799_vm0, %v3829_v16, %v546_v47  ;;  %v3235_v53 = vcombine.low %v850_v41, %v853_v31  ;;  %v5221_v41 = vld [vmem:[#allocation5_spill] sm:$0xff] }
  0x94   : > { %v3234_v1 = vcombine.low %v802_v52, %v805_v0  ;;  %v5222_v0 = vld [vmem:[#allocation6_spill] sm:$0xff] }
  0x95   : > { %1159 = vmatprep.mubr.bf16.mxu0 %v3235_v53  ;;  %v772_v3 = vpop.permute.xlu0 %771 }
  0x96   : > { %v856_v57 = vsel %vm799_vm0, %v3833_v18, %v772_v3  ;;  %1160 = vmatmul.mubr.bf16.vlgmr.msra.gmra.mxu0 %v3234_v1  ;;  %v774_v14 = vpop.permute.xlu1 %773  ;;  %v5223_v3 = vld [vmem:[#allocation7_spill] sm:$0xff] }
  0x97   : > { %v859_v7 = vsel %vm799_vm0, %v3838_v23, %v774_v14 }
  0x98   : > { %v3237_v56 = vcombine.low %v856_v57, %v859_v7 }
  0x99   : > { %v548_v12 = vpop.permute.xlu0 %547 }
  0x9a   : > { %v808_v9 = vsel %vm799_vm0, %v3843_v33, %v548_v12  ;;  %1167 = vmatprep.mubr.bf16.mxu0 %v3237_v56  ;;  %v550_v26 = vpop.permute.xlu1 %549  ;;  %v5224_v56 = vld [vmem:[#allocation8_spill] sm:$0xff] }
  0x9b   : > { %v811_v16 = vsel %vm799_vm0, %v3851_v39, %v550_v26  ;;  %v5225_v26 = vld [vmem:[#allocation9_spill] sm:$0xff] }
  0x9c   : > { %v3236_v36 = vcombine.low %v808_v9, %v811_v16 }
  0x9d   : > { %v776_v48 = vpop.permute.xlu0 %775 }
  0x9e   : > { %v862_v18 = vsel %vm799_vm0, %v3858_v49, %v776_v48  ;;  %1168 = vmatmul.mubr.bf16.gmra.mxu0 %v3236_v36  ;;  %v778_v50 = vpop.permute.xlu1 %777 }
  0x9f   : > { %v865_v23 = vsel %vm799_vm0, %v3865_v55, %v778_v50 }
  0xa0   : > { %v3239_v5 = vcombine.low %v862_v18, %v865_v23  ;;  %v5226_v23 = vld [vmem:[#allocation10_spill] sm:$0xff] }
  0xa1   : > { %v552_v59 = vpop.permute.xlu0 %551 }
  0xa2   : > { %v814_v33 = vsel %vm799_vm0, %v3877_v62, %v552_v59  ;;  %1175 = vmatprep.mubr.bf16.mxu0 %v3239_v5  ;;  %v554_v20 = vpop.permute.xlu1 %553 }
  0xa3   : > { %v817_v39 = vsel %vm799_vm0, %v3884_v2, %v554_v20  ;;  %v4167_v20 = vld [vmem:[%s5185_s2] ss:$0 sm:$0xff] }
  0xa4   : > { %v3238_v21 = vcombine.low %v814_v33, %v817_v39 }
  0xa5   : > { %v780_v30 = vpop.permute.xlu0 %779 }
  0xa6   : > { %v868_v49 = vsel %vm799_vm0, %v3903_v24, %v780_v30  ;;  %1176 = vmatmul.mubr.bf16.gmra.mxu0 %v3238_v21  ;;  %v782_v61 = vpop.permute.xlu1 %781  ;;  %v3655_v30 = vld [vmem:[%s5186_s3 + $0x78] sm:$0xff]  }
  0xa7   : > { %v871_v55 = vsel %vm799_vm0, %v3908_v27, %v782_v61  ;;  %3464 = vmatprep.subr.bf16.mxu1 %v3655_v30 }
  0xa8   : > { %v3241_v28 = vcombine.low %v868_v49, %v871_v55 }
  0xa9   : > { %v556_v54 = vpop.permute.xlu0 %555 }
  0xaa   : > { %v820_v62 = vsel %vm799_vm0, %v3916_v32, %v556_v54  ;;  %1183 = vmatprep.mubr.bf16.mxu0 %v3241_v28  ;;  %v558_v6 = vpop.permute.xlu1 %557 }
  0xab   : > { %v823_v2 = vsel %vm799_vm0, %v3923_v38, %v558_v6  ;;  %v3658_v6 = vld [vmem:[%s5186_s3 + $0x30] sm:$0xff]  }
  0xac   : > { %v3240_v63 = vcombine.low %v820_v62, %v823_v2  ;;  %v3657_v62 = vld [vmem:[%s5186_s3 + $0x70] sm:$0xff]  }
  0xad   : > { %v784_v34 = vpop.permute.xlu0 %783 }
  0xae   : > { %v874_v24 = vsel %vm799_vm0, %v3937_v46, %v784_v34  ;;  %1184 = vmatmul.mubr.bf16.gmra.mxu0 %v3240_v63  ;;  %v786_v10 = vpop.permute.xlu1 %785 }
  0xaf   : > { %v877_v27 = vsel %vm799_vm0, %v3944_v51, %v786_v10 }
  0xb0   : > { %v3243_v60 = vcombine.low %v874_v24, %v877_v27 }
  0xb1   : > { %v560_v17 = vpop.permute.xlu0 %559 }
  0xb2   : > { %v826_v32 = vsel %vm799_vm0, %v3961_v4, %v560_v17  ;;  %1191 = vmatprep.mubr.bf16.mxu0 %v3243_v60  ;;  %v562_v11 = vpop.permute.xlu1 %561 }
  0xb3   : > { %v829_v38 = vsel %vm799_vm0, %v3967_v13, %v562_v11 }
  0xb4   : > { %v3242_v35 = vcombine.low %v826_v32, %v829_v38 }
  0xb5   : > { %v788_v58 = vpop.permute.xlu0 %787 }
  0xb6   : > { %v880_v46 = vsel %vm799_vm0, %v3971_v15, %v788_v58  ;;  %1192 = vmatmul.mubr.bf16.gmra.mxu0 %v3242_v35  ;;  %v790_v19 = vpop.permute.xlu1 %789  ;;  %v3659_v35 = vld [vmem:[%s5186_s3 + $0x68] sm:$0xff]  }
  0xb7   : > { %v883_v51 = vsel %vm799_vm0, %v3981_v25, %v790_v19  ;;  %v3660_v58 = vld [vmem:[%s5186_s3 + $0x28] sm:$0xff]  }
  0xb8   : > { %v3245_v29 = vcombine.low %v880_v46, %v883_v51 }
  0xb9   : > { %v564_v37 = vpop.permute.xlu0 %563 }
  0xba   : > { %v832_v4 = vsel %vm799_vm0, %v5218_v42, %v564_v37  ;;  %v566_v43 = vpop.permute.xlu1 %565  ;;  %1199 = vmatprep.mubr.bf16.mxu0 %v3245_v29 }
  0xbb   : > { %v835_v13 = vsel %vm799_vm0, %v5219_v44, %v566_v43 }
  0xbc   : > { %v3244_v22 = vcombine.low %v832_v4, %v835_v13 }
  0xbd   : > { %v792_v40 = vpop.permute.xlu0 %791 }
  0xbe   : > { %v886_v15 = vsel %vm799_vm0, %v5220_v45, %v792_v40  ;;  %1200 = vmatmul.mubr.bf16.gmra.mxu0 %v3244_v22  ;;  %v794_v47 = vpop.permute.xlu1 %793  ;;  %v3661_v22 = vld [vmem:[%s5186_s3 + $0x60] sm:$0xff]  }
  0xbf   : > { %v889_v25 = vsel %vm799_vm0, %v5221_v41, %v794_v47  ;;  %v3662_v40 = vld [vmem:[%s5186_s3 + $0x20] sm:$0xff]  }
  0xc0   : > { %v3247_v31 = vcombine.low %v886_v15, %v889_v25 }
  0xc1   : > { %v568_v52 = vpop.permute.xlu0 %567 }
  0xc2   : > { %v838_v53 = vsel %vm799_vm0, %v5222_v0, %v568_v52  ;;  %v570_v1 = vpop.permute.xlu1 %569  ;;  %1207 = vmatprep.mubr.bf16.mxu0 %v3247_v31 }
  0xc3   : > { %v841_v57 = vsel %vm799_vm0, %v5223_v3, %v570_v1 }
  0xc4   : > { %v3246_v14 = vcombine.low %v838_v53, %v841_v57 }
  0xc5   : > { %v796_v7 = vpop.permute.xlu0 %795 }
  0xc6   : > { %1208 = vmatmul.mubr.bf16.gmra.mxu0 %v3246_v14  ;;  %v892_v12 = vsel %vm799_vm0, %v5224_v56, %v796_v7  ;;  %v798_v9 = vpop.permute.xlu1 %797 }
  0xc7   : > { %v895_v16 = vsel %vm799_vm0, %v5225_v26, %v798_v9 }
  0xc8   : > { %v3249_v36 = vcombine.low %v892_v12, %v895_v16 }
  0xc9   : > { %v572_v48 = vpop.permute.xlu0 %571 }
  0xca   : > { %v844_v18 = vsel %vm799_vm0, %v4071_v8, %v572_v48  ;;  %v574_v50 = vpop.permute.xlu1 %573  ;;  %1215 = vmatprep.mubr.bf16.mxu0 %v3249_v36  ;;  %v3656_v8 = vld [vmem:[%s5186_s3 + $0x38] sm:$0xff]  }
  0xcb   : > { %v847_v5 = vsel %vm799_vm0, %v5226_v23, %v574_v50  ;;  %3465 = vmatpush3.bf16.msra.mxu1 %v3656_v8  ;;  %v3664_v50 = vld [vmem:[%s5186_s3 + $0x18] sm:$0xff]  }
  0xcc   : > { %v3248_v59 = vcombine.low %v844_v18, %v847_v5  ;;  %3466 = vmatprep.subr.bf16.mxu1 %v3657_v62  ;;  %v3663_v18 = vld [vmem:[%s5186_s3 + $0x58] sm:$0xff]  }
  0xce   : > { %1216 = vmatmul.mubr.bf16.gmra.mxu0 %v3248_v59 }
  0xcf   : > { %3467 = vmatpush3.bf16.msra.mxu1 %v3658_v6  ;;  %v3666_v6 = vld [vmem:[%s5186_s3 + $0x10] sm:$0xff]  }
  0xd0   : > { %3468 = vmatprep.subr.bf16.mxu1 %v3659_v35 }
  0xd3   : > { %3469 = vmatpush3.bf16.msra.mxu1 %v3660_v58  ;;  %v3667_v58 = vld [vmem:[%s5186_s3 + $0x48] sm:$0xff]  }
  0xd4   : > { %3470 = vmatprep.subr.bf16.mxu1 %v3661_v22 }
  0xd7   : > { %3471 = vmatpush3.bf16.msra.mxu1 %v3662_v40 }
  0xd8   : > { %3472 = vmatprep.subr.bf16.mxu1 %v3663_v18 }
  0xdb   : > { %3473 = vmatpush3.bf16.msra.mxu1 %v3664_v50 }
 0x156   : > { %v3416_v33 = vpop.f32.mrf.mxu0 }
 0x158   : > { %v3417_v39 = vpop.f32.mrf.mxu0 }
 0x159   : > { %v3418_v21 = vadd.f32 %v3417_v39, %v3416_v33 }
 0x15a   : > { %v3419_v49 = vpop.f32.mrf.mxu0 }
 0x15b   : > { %v1162_v61 = vadd.f32 %v3418_v21, %v4167_v20 }
 0x15c   : > { %v3420_v55 = vpop.f32.mrf.mxu0 }
 0x15d   : > { %v1224_v28 = vmax.f32 %v1162_v61, 0.0  ;;  %v3421_v54 = vadd.f32 %v3420_v55, %v3419_v49  ;;  %v3665_v61 = vld [vmem:[%s5186_s3 + $0x50] sm:$0xff]  }
 0x15e   : > { %v3422_v2 = vpop.f32.mrf.mxu0  ;;  %3474 = vmatprep.subr.bf16.mxu1 %v3665_v61 }
 0x15f   : > { %v4182_v63 = vpack.c.bf16 %v1224_v28, %v1224_v28  ;;  %v1165_v34 = vadd.f32 %v3421_v54, %v4167_v20  ;;  %3475 = vmatpush3.bf16.msra.mxu1 %v3666_v6 }
 0x160   : > { %v3423_v24 = vpop.f32.mrf.mxu0  ;;  %3476 = vmatprep.subr.bf16.mxu1 %v3667_v58 }
 0x161   : > { %v1225_v27 = vmax.f32 %v1165_v34, 0.0  ;;  %v3424_v60 = vadd.f32 %v3423_v24, %v3422_v2  ;;  %v4191_v17 = vrot.slane %v4182_v63, 1  ;;  %v1368_v32 = vshrl.u32 %v4182_v63, 16 }
 0x162   : > { %v3425_v11 = vpop.f32.mrf.mxu0  ;;  %v1305_v38 = vshll.u32 %v4182_v63, 16  ;;  %v1434_v13 = vrot.slane %v4182_v63, 2 }
 0x163   : > { %v1170_v46 = vadd.f32 %v3424_v60, %v4167_v20  ;;  %v1392_v19 = vrot.slane %v1368_v32, 1  ;;  %v1398_v51 = vsel %vm4186_vm3, %v1368_v32, %v4191_v17  ;;  %v4205_v29 = vpack.c.bf16 %v1225_v27, %v1225_v27 }
 0x164   : > { %v3426_v37 = vpop.f32.mrf.mxu0  ;;  %v1422_v42 = vrot.slane %v1305_v38, 2  ;;  %v1476_v25 = vrot.slane %v1368_v32, 2  ;;  %v4242_v48 = vrot.slane %v1305_v38, 1 }
 0x165   : > { %v1226_v4 = vmax.f32 %v1170_v46, 0.0  ;;  %v3427_v43 = vadd.f32 %v3426_v37, %v3425_v11  ;;  %v1406_v44 = vsel %vm1340_vm1, %v1398_v51, %v1392_v19  ;;  %v1482_v31 = vsel %vm4186_vm3, %v1392_v19, %v1434_v13 }
 0x166   : > { %1842 = vrot.lane.b32.xlu0 %v1406_v44, %s3732_s18  ;;  %v3428_v45 = vpop.f32.mrf.mxu0  ;;  %v1440_v15 = vsel %vm4186_vm3, %v4191_v17, %v1422_v42  ;;  %v4226_v53 = vrot.slane %v4205_v29, 1  ;;  %v4229_v1 = vshrl.u32 %v4205_v29, 16  ;;  %v1507_v3 = vshll.u32 %v4205_v29, 16 }
 0x167   : > { %v4219_v47 = vpack.c.bf16 %v1226_v4, %v1226_v4  ;;  %v1173_v41 = vadd.f32 %v3427_v43, %v4167_v20  ;;  %v1448_v0 = vsel %vm1340_vm1, %v1440_v15, %v1434_v13  ;;  %v1490_v5 = vsel %vm1340_vm1, %v1482_v31, %v1476_v25  ;;  %v3668_v4 = vld [vmem:[%s5186_s3 + $0x8] sm:$0xff]   ;;  %v3669_v31 = vld [vmem:[%s5186_s3 + $0x40] sm:$0xff]  }
 0x168   : > { %v3429_v52 = vpop.f32.mrf.mxu0  ;;  %v1590_v59 = vrot.slane %v4229_v1, 1  ;;  %v1620_v39 = vrot.slane %v1507_v3, 2  ;;  %v1596_v49 = vsel %vm4186_vm3, %v4229_v1, %v4226_v53  ;;  %v1632_v51 = vrot.slane %v4205_v29, 2  ;;  %3477 = vmatpush3.bf16.msra.mxu1 %v3668_v4 }
 0x169   : > { %v1227_v57 = vmax.f32 %v1173_v41, 0.0  ;;  %v3430_v14 = vadd.f32 %v3429_v52, %v3428_v45  ;;  %v4233_v7 = vrot.slane %v4219_v47, 1  ;;  %v1370_v56 = vshrl.u32 %v4219_v47, 16  ;;  %3478 = vmatprep.subr.bf16.mxu1 %v3669_v31 }
 0x16a   : > { %1860 = vrot.lane.b32.xlu0 %v1448_v0, %s3731_s28  ;;  %v3431_v12 = vpop.f32.mrf.mxu0  ;;  %v1309_v9 = vshll.u32 %v4219_v47, 16  ;;  %v1435_v62 = vrot.slane %v4219_v47, 2  ;;  %v1604_v24 = vsel %vm1340_vm1, %v1596_v49, %v1590_v59  ;;  %v1638_v27 = vsel %vm4186_vm3, %v4226_v53, %v1620_v39 }
 0x16b   : > { %v1178_v26 = vadd.f32 %v3430_v14, %v4167_v20  ;;  %v1393_v16 = vrot.slane %v1370_v56, 1  ;;  %v1399_v36 = vsel %vm4186_vm3, %v1370_v56, %v4233_v7  ;;  %v4256_v21 = vpack.c.bf16 %v1227_v57, %v1227_v57  ;;  %v3670_v14 = vld [vmem:[%s5186_s3] sm:$0xff]  }
 0x16c   : > { %v3432_v23 = vpop.f32.mrf.mxu0  ;;  %v1423_v33 = vrot.slane %v1309_v9, 2  ;;  %v1477_v11 = vrot.slane %v1370_v56, 2  ;;  %v1646_v44 = vsel %vm1340_vm1, %v1638_v27, %v1632_v51  ;;  %v1674_v13 = vrot.slane %v4229_v1, 2  ;;  %3479 = vmatpush3.bf16.msra.mxu1 %v3670_v14 }
 0x16d   : > { %v1228_v30 = vmax.f32 %v1178_v26, 0.0  ;;  %v1409_v8 = vsel %vm1340_vm1, %v1399_v36, %v1393_v16  ;;  %v3433_v55 = vadd.f32 %v3432_v23, %v3431_v12  ;;  %v4287_v38 = vshrl.u32 %v4256_v21, 16 }
 0x16e   : > { %1878 = vrot.lane.b32.xlu0 %v1490_v5, %s3733_s27  ;;  %1844 = vrot.lane.b32.xlu1 %v1409_v8, %s3732_s18  ;;  %v3434_v28 = vpop.f32.mrf.mxu0  ;;  %v1441_v54 = vsel %vm4186_vm3, %v4233_v7, %v1423_v33  ;;  %v1511_v35 = vshll.u32 %v4256_v21, 16  ;;  %v1483_v37 = vsel %vm4186_vm3, %v1393_v16, %v1435_v62  ;;  %v4302_v42 = vrot.slane %v4256_v21, 1 }
 0x16f   : > { %v4275_v2 = vpack.c.bf16 %v1228_v30, %v1228_v30  ;;  %v1451_v32 = vsel %vm1340_vm1, %v1441_v54, %v1435_v62  ;;  %v1181_v46 = vadd.f32 %v3433_v55, %v4167_v20  ;;  %v1680_v22 = vsel %vm4186_vm3, %v1590_v59, %v1632_v51 }
 0x170   : > { %v3435_v34 = vpop.f32.mrf.mxu0  ;;  %v1493_v45 = vsel %vm1340_vm1, %v1483_v37, %v1477_v11  ;;  %v1591_v15 = vrot.slane %v4287_v38, 1  ;;  %v1621_v41 = vrot.slane %v1511_v35, 2  ;;  %v1597_v1 = vsel %vm4186_vm3, %v4287_v38, %v4302_v42 }
 0x171   : > { %v4312_v40 = vshrl.u32 %v4275_v2, 16  ;;  %v1313_v25 = vshll.u32 %v4275_v2, 16  ;;  %v1229_v52 = vmax.f32 %v1181_v46, 0.0  ;;  %v4329_v57 = vrot.slane %v4275_v2, 1 }
 0x172   : > { %1896 = vrot.lane.b32.xlu0 %v1604_v24, %s3732_s18  ;;  %1862 = vrot.lane.b32.xlu1 %v1451_v32, %s3731_s28  ;;  %v4296_v19 = vpop.f32.mrf.mxu0  ;;  %v1688_v12 = vsel %vm1340_vm1, %v1680_v22, %v1674_v13  ;;  %v1607_v36 = vsel %vm1340_vm1, %v1597_v1, %v1591_v15  ;;  %v1639_v18 = vsel %vm4186_vm3, %v4302_v42, %v1621_v41  ;;  %v1633_v59 = vrot.slane %v4256_v21, 2 }
 0x173   : > { %v1394_v26 = vrot.slane %v4312_v40, 1  ;;  %v1424_v50 = vrot.slane %v1313_v25, 2  ;;  %v4342_v23 = vpack.c.bf16 %v1229_v52, %v1229_v52  ;;  %v1400_v33 = vsel %vm4186_vm3, %v4312_v40, %v4329_v57 }
 0x174   : > { %v3438_v43 = vpop.f32.mrf.mxu0  ;;  %v3436_v39 = vadd.f32 %v3435_v34, %v3434_v28  ;;  %v1649_v49 = vsel %vm1340_vm1, %v1639_v18, %v1633_v59  ;;  %v1675_v61 = vrot.slane %v4287_v38, 2  ;;  %v1681_v55 = vsel %vm4186_vm3, %v1591_v15, %v1633_v59 }
 0x175   : > { %v1412_v6 = vsel %vm1340_vm1, %v1400_v33, %v1394_v26  ;;  %v1442_v24 = vsel %vm4186_vm3, %v4329_v57, %v1424_v50  ;;  %v1436_v34 = vrot.slane %v4275_v2, 2  ;;  %v4364_v27 = vshrl.u32 %v4342_v23, 16 }
 0x176   : > { %1914 = vrot.lane.b32.xlu0 %v1646_v44, %s3731_s28  ;;  %1880 = vrot.lane.b32.xlu1 %v1493_v45, %s3733_s27  ;;  %v3440_v0 = vpop.f32.mrf.mxu0  ;;  %v1186_v32 = vadd.f32 %v3436_v39, %v4167_v20  ;;  %v5206_v58 = vshll.u32 %v4342_v23, 16  ;;  %v1691_v51 = vsel %vm1340_vm1, %v1681_v55, %v1675_v61  ;;  %v1478_v4 = vrot.slane %v4312_v40, 2 }
 0x177   : > { %v1454_v37 = vsel %vm1340_vm1, %v1442_v24, %v1436_v34  ;;  %v4375_v44 = vrot.slane %v4342_v23, 1  ;;  %v3439_v41 = vadd.f32 %v3438_v43, %v4296_v19  ;;  %v1484_v40 = vsel %vm4186_vm3, %v1394_v26, %v1436_v34 }
 0x178   : > { %v3441_v56 = vpop.f32.mrf.mxu0  ;;  %v1592_v52 = vrot.slane %v4364_v27, 1  ;;  %v1622_v19 = vrot.slane %v5206_v58, 2  ;;  %v1496_v18 = vsel %vm1340_vm1, %v1484_v40, %v1478_v4  ;;  %v1634_v61 = vrot.slane %v4342_v23, 2 }
 0x179   : > { %v3442_v16 = vadd.f32 %v3441_v56, %v3440_v0  ;;  %v1598_v26 = vsel %vm4186_vm3, %v4364_v27, %v4375_v44 }
 0x17a   : > { %1932 = vrot.lane.b32.xlu0 %v1688_v12, %s3733_s27  ;;  %1898 = vrot.lane.b32.xlu1 %v1607_v36, %s3732_s18  ;;  %v3443_v5 = vpop.f32.mrf.mxu0  ;;  %v1640_v55 = vsel %vm4186_vm3, %v4375_v44, %v1622_v19 }
 0x17b   : > { %v1194_v30 = vadd.f32 %v3442_v16, %v4167_v20  ;;  %v1652_v40 = vsel %vm1340_vm1, %v1640_v55, %v1634_v61 }
 0x17c   : > { %v3444_v8 = vpop.f32.mrf.mxu0 }
 0x17d   : > { %v1232_v54 = vmax.f32 %v1194_v30, 0.0  ;;  %v3445_v62 = vadd.f32 %v3444_v8, %v3443_v5  ;;  %v1230_v5 = vmax.f32 %v1186_v32, 0.0  ;;  %v1189_v8 = vadd.f32 %v3439_v41, %v4167_v20 }
 0x17e   : > { %1916 = vrot.lane.b32.xlu1 %v1649_v49, %s3731_s28  ;;  %1846 = vrot.lane.b32.xlu0 %v1412_v6, %s3732_s18  ;;  %v3446_v28 = vpop.f32.mrf.mxu0  ;;  %v1610_v49 = vsel %vm1340_vm1, %v1598_v26, %v1592_v52  ;;  %v1682_v41 = vsel %vm4186_vm3, %v1592_v52, %v1634_v61 }
 0x17f   : > { %v4367_v11 = vpack.c.bf16 %v1232_v54, %v1232_v54  ;;  %v1197_v38 = vadd.f32 %v3445_v62, %v4167_v20 }
 0x180   : > { %v3447_v46 = vpop.f32.mrf.mxu0 }
 0x181   : > { %v1233_v13 = vmax.f32 %v1197_v38, 0.0  ;;  %v3448_v22 = vadd.f32 %v3447_v46, %v3446_v28  ;;  %v4378_v45 = vrot.slane %v4367_v11, 1  ;;  %v1374_v15 = vshrl.u32 %v4367_v11, 16 }
 0x182   : > { %1934 = vrot.lane.b32.xlu1 %v1691_v51, %s3733_s27  ;;  %1864 = vrot.lane.b32.xlu0 %v1454_v37, %s3731_s28  ;;  %v3449_v31 = vpop.f32.mrf.mxu0  ;;  %v5207_v0 = vshll.u32 %v4367_v11, 16  ;;  %v1437_v39 = vrot.slane %v4367_v11, 2  ;;  %v4428_v51 = vpack.c.bf16 %v1230_v5, %v1230_v5 }
 0x183   : > { %v1202_v1 = vadd.f32 %v3448_v22, %v4167_v20  ;;  %v1395_v14 = vrot.slane %v1374_v15, 1  ;;  %v1401_v56 = vsel %vm4186_vm3, %v1374_v15, %v4378_v45  ;;  %v4394_v43 = vpack.c.bf16 %v1233_v13, %v1233_v13 }
 0x184   : > { %v3450_v12 = vpop.f32.mrf.mxu0  ;;  %v1425_v16 = vrot.slane %v5207_v0, 2  ;;  %v1479_v62 = vrot.slane %v1374_v15, 2  ;;  %v1231_v13 = vmax.f32 %v1189_v8, 0.0  ;;  %v1676_v15 = vrot.slane %v4364_v27, 2 }
 0x185   : > { %v1234_v36 = vmax.f32 %v1202_v1, 0.0  ;;  %v1415_v50 = vsel %vm1340_vm1, %v1401_v56, %v1395_v14  ;;  %v3451_v59 = vadd.f32 %v3450_v12, %v3449_v31  ;;  %v1485_v6 = vsel %vm4186_vm3, %v1395_v14, %v1437_v39 }
 0x186   : > { %1882 = vrot.lane.b32.xlu0 %v1496_v18, %s3733_s27  ;;  %1848 = vrot.lane.b32.xlu1 %v1415_v50, %s3732_s18  ;;  %v3452_v33 = vpop.f32.mrf.mxu0  ;;  %v1443_v30 = vsel %vm4186_vm3, %v4378_v45, %v1425_v16  ;;  %v4419_v24 = vrot.slane %v4394_v43, 1  ;;  %v4422_v28 = vshrl.u32 %v4394_v43, 16  ;;  %v5205_v46 = vshll.u32 %v4394_v43, 16 }
 0x187   : > { %v4424_v34 = vpack.c.bf16 %v1234_v36, %v1234_v36  ;;  %v1457_v38 = vsel %vm1340_vm1, %v1443_v30, %v1437_v39  ;;  %v1205_v37 = vadd.f32 %v3451_v59, %v4167_v20  ;;  %v1499_v1 = vsel %vm1340_vm1, %v1485_v6, %v1479_v62 }
 0x188   : > { %v3453_v54 = vpop.f32.mrf.mxu0  ;;  %v1593_v14 = vrot.slane %v4422_v28, 1  ;;  %v1599_v56 = vsel %vm4186_vm3, %v4422_v28, %v4419_v24  ;;  %v1623_v12 = vrot.slane %v5205_v46, 2  ;;  %v4455_v50 = vpack.c.bf16 %v1231_v13, %v1231_v13 }
 0x189   : > { %v3454_v32 = vadd.f32 %v3453_v54, %v3452_v33  ;;  %v4447_v27 = vshrl.u32 %v4424_v34, 16  ;;  %v5204_v52 = vshll.u32 %v4424_v34, 16  ;;  %v1235_v26 = vmax.f32 %v1205_v37, 0.0  ;;  %v3671_v37 = vld [vmem:[%s5186_s3 + $0xf8] sm:$0xff]  }
 0x18a   : > { %1900 = vrot.lane.b32.xlu0 %v1610_v49, %s3732_s18  ;;  %1866 = vrot.lane.b32.xlu1 %v1457_v38, %s3731_s28  ;;  %v3455_v4 = vpop.f32.mrf.mxu0  ;;  %v4453_v36 = vrot.slane %v4424_v34, 1  ;;  %v1694_v59 = vsel %vm1340_vm1, %v1682_v41, %v1676_v15  ;;  %v1613_v33 = vsel %vm1340_vm1, %v1599_v56, %v1593_v14  ;;  %v4461_v30 = vrot.slane %v4428_v51, 1 }
 0x18b   : > { %v1210_v22 = vadd.f32 %v3454_v32, %v4167_v20  ;;  %v1641_v49 = vsel %vm4186_vm3, %v4419_v24, %v1623_v12  ;;  %v1396_v61 = vrot.slane %v4447_v27, 1  ;;  %v1426_v55 = vrot.slane %v5204_v52, 2  ;;  %3498 = vmatprep.subr.bf16.mxu1 %v3671_v37 }
 0x18c   : > { %v3456_v31 = vpop.f32.mrf.mxu0  ;;  %v4469_v54 = vpack.c.bf16 %v1235_v26, %v1235_v26  ;;  %v1635_v6 = vrot.slane %v4394_v43, 2  ;;  %v1402_v32 = vsel %vm4186_vm3, %v4447_v27, %v4453_v36  ;;  %v4484_v13 = vrot.slane %v4455_v50, 1 }
 0x18d   : > { %v3457_v19 = vadd.f32 %v3456_v31, %v3455_v4  ;;  %v1236_v16 = vmax.f32 %v1210_v22, 0.0  ;;  %v4487_v22 = vshrl.u32 %v4455_v50, 16  ;;  %v4490_v15 = vshrl.u32 %v4428_v51, 16 }
 0x18e   : > { %1918 = vrot.lane.b32.xlu0 %v1652_v40, %s3731_s28  ;;  %1884 = vrot.lane.b32.xlu1 %v1499_v1, %s3733_s27  ;;  %v3458_v18 = vpop.f32.mrf.mxu0  ;;  %v1655_v31 = vsel %vm1340_vm1, %v1641_v49, %v1635_v6  ;;  %v1677_v40 = vrot.slane %v4422_v28, 2  ;;  %v1683_v1 = vsel %vm4186_vm3, %v1593_v14, %v1635_v6  ;;  %v1438_v12 = vrot.slane %v4424_v34, 2 }
 0x18f   : > { %v1213_v5 = vadd.f32 %v3457_v19, %v4167_v20  ;;  %v4471_v62 = vpack.c.bf16 %v1236_v16, %v1236_v16  ;;  %v1418_v19 = vsel %vm1340_vm1, %v1402_v32, %v1396_v61  ;;  %v1444_v26 = vsel %vm4186_vm3, %v4453_v36, %v1426_v55 }
 0x190   : > { %v3459_v39 = vpop.f32.mrf.mxu0  ;;  %v1574_v14 = vshrl.u32 %v4469_v54, 16  ;;  %v1697_v49 = vsel %vm1340_vm1, %v1683_v1, %v1677_v40  ;;  %v1460_v37 = vsel %vm1340_vm1, %v1444_v26, %v1438_v12  ;;  %v1486_v40 = vsel %vm4186_vm3, %v1396_v61, %v1438_v12 }
 0x191   : > { %v1237_v8 = vmax.f32 %v1213_v5, 0.0  ;;  %v3460_v4 = vadd.f32 %v3459_v39, %v3458_v18  ;;  %v4504_v16 = vshrl.u32 %v4471_v62, 16  ;;  %v4509_v28 = vrot.slane %v4471_v62, 1 }
 0x192   : > { %1936 = vrot.lane.b32.xlu0 %v1694_v59, %s3733_s27  ;;  %1902 = vrot.lane.b32.xlu1 %v1613_v33, %s3732_s18  ;;  %v3461_v38 = vpop.f32.mrf.mxu0  ;;  %v5200_v18 = vshll.u32 %v4471_v62, 16  ;;  %v5201_v33 = vshll.u32 %v4469_v54, 16  ;;  %v5208_v39 = vrot.slane %v4487_v22, 1  ;;  %v1594_v1 = vrot.slane %v1574_v14, 1 }
 0x193   : > { %v4492_v41 = vpack.c.bf16 %v1237_v8, %v1237_v8  ;;  %v1218_v59 = vadd.f32 %v3460_v4, %v4167_v20  ;;  %v5202_v8 = vshll.u32 %v4455_v50, 16  ;;  %v1397_v4 = vrot.slane %v4504_v16, 1 }
 0x194   : > { %v3462_v56 = vpop.f32.mrf.mxu0  ;;  %v1636_v26 = vrot.slane %v4469_v54, 2 }
 0x195   : > { %v3463_v5 = vadd.f32 %v3462_v56, %v3461_v38  ;;  %v1576_v55 = vshrl.u32 %v4492_v41, 16  ;;  %v5203_v32 = vshll.u32 %v4492_v41, 16  ;;  %v1480_v38 = vrot.slane %v4447_v27, 2 }
 0x196   : > { %1920 = vrot.lane.b32.xlu1 %v1655_v31, %s3731_s28  ;;  %1850 = vrot.lane.b32.xlu0 %v1418_v19, %s3732_s18  ;;  %v4525_v31 = vrot.slane %v4469_v54, 1  ;;  %v1427_v27 = vrot.slane %v5200_v18, 2  ;;  %v1238_v56 = vmax.f32 %v1218_v59, 0.0  ;;  %v1624_v19 = vrot.slane %v5201_v33, 2 }
 0x197   : > { %v1221_v6 = vadd.f32 %v3463_v5, %v4167_v20  ;;  %v1403_v20 = vsel %vm4186_vm3, %v4504_v16, %v4509_v28  ;;  %v4541_v5 = vrot.slane %v4492_v41, 1  ;;  %v1625_v12 = vrot.slane %v5203_v32, 2 }
 0x198   : > { %v1502_v60 = vsel %vm1340_vm1, %v1486_v40, %v1480_v38  ;;  %v1421_v18 = vsel %vm1340_vm1, %v1403_v20, %v1397_v4  ;;  %v1439_v59 = vrot.slane %v4471_v62, 2  ;;  %v4551_v33 = vrot.slane %v5202_v8, 2 }
 0x199   : > { %v1239_v61 = vmax.f32 %v1221_v6, 0.0  ;;  %v1600_v6 = vsel %vm4186_vm3, %v1574_v14, %v4525_v31  ;;  %v1445_v38 = vsel %vm4186_vm3, %v4509_v28, %v1427_v27  ;;  %v1678_v40 = vrot.slane %v1574_v14, 2 }
 0x19a   : > { %1938 = vrot.lane.b32.xlu1 %v1697_v49, %s3733_s27  ;;  %1868 = vrot.lane.b32.xlu0 %v1460_v37, %s3731_s28  ;;  %v1595_v49 = vrot.slane %v1576_v55, 1  ;;  %v1637_v37 = vrot.slane %v4492_v41, 2  ;;  %v1800_v20 = vsel %vm4186_vm3, %v4487_v22, %v4484_v13  ;;  %v1684_v8 = vsel %vm4186_vm3, %v1594_v1, %v1636_v26 }
 0x19b   : > { %v1679_v32 = vrot.slane %v1576_v55, 2  ;;  %v4573_v52 = vpack.c.bf16 %v1238_v56, %v1238_v56  ;;  %v4575_v14 = vpack.c.bf16 %v1239_v61, %v1239_v61  ;;  %v1643_v27 = vsel %vm4186_vm3, %v4541_v5, %v1625_v12 }
 0x19c   : > { %v1685_v46 = vsel %vm4186_vm3, %v1595_v49, %v1637_v37  ;;  %v1463_v58 = vsel %vm1340_vm1, %v1445_v38, %v1439_v59  ;;  %v1804_v0 = vsel %vm1340_vm1, %v1800_v20, %v5208_v39  ;;  %v1705_v12 = vshll.u32 %v4428_v51, 16 }
 0x19d   : > { %v1703_v38 = vsel %vm1340_vm1, %v1685_v46, %v1679_v32  ;;  %v1481_v20 = vrot.slane %v4504_v16, 2  ;;  %v1487_v39 = vsel %vm4186_vm3, %v1397_v4, %v1439_v59  ;;  %v1509_v46 = vrot.slane %v1507_v3, 1 }
 0x19e   : > { %1886 = vrot.lane.b32.xlu0 %v1502_v60, %s3733_s27  ;;  %1852 = vrot.lane.b32.xlu1 %v1421_v18, %s3732_s18  ;;  %v1642_v60 = vsel %vm4186_vm3, %v4525_v31, %v1624_v19  ;;  %v1601_v18 = vsel %vm4186_vm3, %v1576_v55, %v4541_v5  ;;  %v1616_v19 = vsel %vm1340_vm1, %v1600_v6, %v1594_v1  ;;  %v1513_v16 = vrot.slane %v1511_v35, 1 }
 0x19f   : > { %v1814_v55 = vsel %vm4186_vm3, %v4484_v13, %v4551_v33  ;;  %v1658_v56 = vsel %vm1340_vm1, %v1642_v60, %v1636_v26  ;;  %v1619_v61 = vsel %vm1340_vm1, %v1601_v18, %v1595_v49  ;;  %v1700_v1 = vsel %vm1340_vm1, %v1684_v8, %v1678_v40 }
 0x1a0   : > { %v1661_v6 = vsel %vm1340_vm1, %v1643_v27, %v1637_v37  ;;  %v4607_v26 = vrot.slane %v4573_v52, 1  ;;  %v1709_v8 = vshll.u32 %v4573_v52, 16  ;;  %v1311_v49 = vrot.slane %v1309_v9, 1 }
 0x1a1   : > { %v1315_v32 = vrot.slane %v1313_v25, 1  ;;  %v5229_v4 = vshll.u32 %v4367_v11, 16  ;;  %v5230_v59 = vshll.u32 %v4342_v23, 16  ;;  %v5231_v9 = vshll.u32 %v4394_v43, 16 }
 0x1a2   : > { %1904 = vrot.lane.b32.xlu0 %v1616_v19, %s3732_s18  ;;  %1870 = vrot.lane.b32.xlu1 %v1463_v58, %s3731_s28  ;;  %v4603_v19 = vrot.slane %v4575_v14, 1  ;;  %v1775_v58 = vshll.u32 %v4575_v14, 16  ;;  %v5232_v3 = vshll.u32 %v4424_v34, 16  ;;  %v1344_v35 = vsel %vm4186_vm3, %v4219_v47, %v1311_v49 }
 0x1a3   : > { %v1319_v37 = vrot.slane %v5229_v4, 1  ;;  %v1517_v40 = vrot.slane %v5230_v59, 1  ;;  %v1521_v60 = vrot.slane %v5231_v9, 1  ;;  %v1542_v25 = vsel %vm4186_vm3, %v4205_v29, %v1509_v46 }
 0x1a4   : > { %v1323_v18 = vrot.slane %v5232_v3, 1  ;;  %v1543_v27 = vsel %vm4186_vm3, %v4256_v21, %v1513_v16  ;;  %v4646_v4 = vsel %vm1340_vm1, %v1542_v25, %v4226_v53  ;;  %v1707_v16 = vrot.slane %v1705_v12, 1 }
 0x1a5   : > { %v4650_v47 = vsel %vm1340_vm1, %v1543_v27, %v4302_v42  ;;  %v1346_v21 = vsel %vm4186_vm3, %v4367_v11, %v1319_v37  ;;  %v1545_v53 = vsel %vm4186_vm3, %v4394_v43, %v1521_v60  ;;  %v5233_v11 = vshll.u32 %v4471_v62, 16 }
 0x1a6   : > { %1922 = vrot.lane.b32.xlu0 %v1658_v56, %s3731_s28  ;;  %1906 = vrot.lane.b32.xlu1 %v1619_v61, %s3732_s18  ;;  %v1345_v56 = vsel %vm4186_vm3, %v4275_v2, %v1315_v32  ;;  %v4642_v61 = vsel %vm1340_vm1, %v1344_v35, %v4233_v7  ;;  %v1544_v7 = vsel %vm4186_vm3, %v4342_v23, %v1517_v40  ;;  %v1711_v32 = vrot.slane %v1709_v8, 1 }
 0x1a7   : > { %v4654_v29 = vsel %vm1340_vm1, %v1345_v56, %v4329_v57  ;;  %v1347_v2 = vsel %vm4186_vm3, %v4424_v34, %v1323_v18  ;;  %v4672_v42 = vsel %vm1340_vm1, %v1346_v21, %v4378_v45  ;;  %v4676_v57 = vsel %vm1340_vm1, %v1544_v7, %v4375_v44 }
 0x1a8   : > { %v4680_v23 = vsel %vm1340_vm1, %v1545_v53, %v4419_v24  ;;  %v1327_v43 = vrot.slane %v5233_v11, 1  ;;  %v4686_v34 = vsel %vm1340_vm1, %v1347_v2, %v4453_v36  ;;  %v5235_v45 = vshll.u32 %v4492_v41, 16 }
 0x1a9   : > { %v5236_v44 = vshll.u32 %v4455_v50, 16  ;;  %v1777_v36 = vrot.slane %v1775_v58, 1  ;;  %v1812_v9 = vrot.slane %v4455_v50, 2  ;;  %v1792_v60 = vshrl.u32 %v4575_v14, 16 }
 0x1aa   : > { %1940 = vrot.lane.b32.xlu0 %v1700_v1, %s3733_s27  ;;  %1924 = vrot.lane.b32.xlu1 %v1661_v6, %s3731_s28  ;;  %v5234_v1 = vshll.u32 %v4469_v54, 16  ;;  %v1529_v49 = vrot.slane %v5235_v45, 1  ;;  %v1348_v24 = vsel %vm4186_vm3, %v4471_v62, %v1327_v43  ;;  %v1505_v35 = vsel %vm1340_vm1, %v1487_v39, %v1481_v20 }
 0x1ab   : > { %v1773_v46 = vrot.slane %v5236_v44, 1  ;;  %v4705_v37 = vsel %vm1340_vm1, %v1348_v24, %v4509_v28  ;;  %v1818_v18 = vsel %vm1340_vm1, %v1814_v55, %v1812_v9  ;;  %v1826_v25 = vrot.slane %v4487_v22, 2 }
 0x1ac   : > { %v1525_v6 = vrot.slane %v5234_v1, 1  ;;  %v1547_v62 = vsel %vm4186_vm3, %v4492_v41, %v1529_v49  ;;  %v1732_v27 = vrot.slane %v4490_v15, 1  ;;  %v5237_v56 = vrot.slane %v4487_v22, 1 }
 0x1ad   : > { %v1782_v40 = vsel %vm4186_vm3, %v4455_v50, %v1773_v46  ;;  %v1783_v50 = vsel %vm4186_vm3, %v4575_v14, %v1777_v36  ;;  %v1742_v33 = vrot.slane %v1705_v12, 2  ;;  %v1799_v39 = vrot.slane %v1792_v60, 1 }
 0x1ae   : > { %v1546_v59 = vsel %vm4186_vm3, %v4469_v54, %v1525_v6  ;;  %1964 = vrot.lane.b32.xlu0 %v1804_v0, %s3732_s18  ;;  %1942 = vrot.lane.b32.xlu1 %v1703_v38, %s3733_s27  ;;  %v4725_v54 = vsel %vm1340_vm1, %v1547_v62, %v4541_v5  ;;  %v4729_v41 = vsel %vm1340_vm1, %v1782_v40, %v4484_v13  ;;  %v1809_v12 = vrot.slane %v1775_v58, 2 }
 0x1af   : > { %v4721_v28 = vsel %vm1340_vm1, %v1546_v59, %v4525_v31  ;;  %v1716_v0 = vsel %vm4186_vm3, %v4428_v51, %v1707_v16  ;;  %v1717_v31 = vsel %vm4186_vm3, %v4573_v52, %v1711_v32  ;;  %v4747_v38 = vsel %vm1340_vm1, %v1783_v50, %v4603_v19 }
 0x1b0   : > { %v4743_v5 = vsel %vm1340_vm1, %v1716_v0, %v4461_v30  ;;  %v4751_v3 = vsel %vm1340_vm1, %v1717_v31, %v4607_v26  ;;  %v1828_v21 = vsel %vm4186_vm3, %v5237_v56, %v1812_v9  ;;  %v1734_v13 = vsel %vm4186_vm3, %v4490_v15, %v4461_v30 }
 0x1b1   : > { %v1801_v55 = vsel %vm4186_vm3, %v1792_v60, %v4603_v19  ;;  %v1832_v20 = vsel %vm1340_vm1, %v1828_v21, %v1826_v25  ;;  %v1738_v22 = vsel %vm1340_vm1, %v1734_v13, %v1732_v27  ;;  %v1748_v7 = vsel %vm4186_vm3, %v4461_v30, %v1742_v33  ;;  %v3690_v25 = vld [vmem:[%s5188_s5 + $0x30] sm:$0xff]  }
 0x1b2   : > { %1970 = vrot.lane.b32.xlu0 %v1818_v18, %s3731_s28  ;;  %1888 = vrot.lane.b32.xlu1 %v1505_v35, %s3733_s27  ;;  %v1746_v53 = vrot.slane %v4428_v51, 2  ;;  %v1807_v2 = vsel %vm1340_vm1, %v1801_v55, %v1799_v39  ;;  %v1760_v43 = vrot.slane %v4490_v15, 2  ;;  %v1813_v1 = vrot.slane %v4575_v14, 2 }
 0x1b3   : > { %v1726_v6 = vshrl.u32 %v4573_v52, 16  ;;  %v1815_v51 = vsel %vm4186_vm3, %v4603_v19, %v1809_v12  ;;  %v1827_v15 = vrot.slane %v1792_v60, 2  ;;  %v1743_v19 = vrot.slane %v1709_v8, 2 }
 0x1b4   : > { %v1752_v11 = vsel %vm1340_vm1, %v1748_v7, %v1746_v53  ;;  %v1762_v30 = vsel %vm4186_vm3, %v1732_v27, %v1746_v53  ;;  %v1821_v45 = vsel %vm1340_vm1, %v1815_v51, %v1813_v1  ;;  %v1829_v14 = vsel %vm4186_vm3, %v1799_v39, %v1813_v1 }
 0x1b5   : > { %v1766_v58 = vsel %vm1340_vm1, %v1762_v30, %v1760_v43  ;;  %v1733_v49 = vrot.slane %v1726_v6, 1  ;;  %v1735_v44 = vsel %vm4186_vm3, %v1726_v6, %v4607_v26  ;;  %v1835_v46 = vsel %vm1340_vm1, %v1829_v14, %v1827_v15  ;;  %v3673_v14 = vld [vmem:[%s5186_s3 + $0xf0] sm:$0xff]  }
 0x1b6   : > { %1976 = vrot.lane.b32.xlu0 %v1832_v20, %s3733_s27  ;;  %1946 = vrot.lane.b32.xlu1 %v1738_v22, %s3732_s18  ;;  %v1747_v16 = vrot.slane %v4573_v52, 2  ;;  %v1749_v36 = vsel %vm4186_vm3, %v4607_v26, %v1743_v19  ;;  %v1761_v59 = vrot.slane %v1726_v6, 2  ;;  %v5238_v26 = vsel %vm4186_vm3, %v4182_v63, %v4242_v48 }
 0x1b7   : > { %v1741_v24 = vsel %vm1340_vm1, %v1735_v44, %v1733_v49  ;;  %v1352_v0 = vsel %vm1340_vm1, %v5238_v26, %v4191_v17 }
 0x1b8   : > { %v1755_v32 = vsel %vm1340_vm1, %v1749_v36, %v1747_v16  ;;  %v1763_v8 = vsel %vm4186_vm3, %v1733_v49, %v1747_v16  ;;  %v3675_v36 = vld [vmem:[%s5186_s3 + $0xe8] sm:$0xff]  }
 0x1b9   : > { %v1769_v62 = vsel %vm1340_vm1, %v1763_v8, %v1761_v59  ;;  %v3676_v59 = vld [vmem:[%s5186_s3 + $0xa8] sm:$0xff]  }
 0x1ba   : > { %1952 = vrot.lane.b32.xlu1 %v1752_v11, %s3731_s28  ;;  %1966 = vrot.lane.b32.xlu0 %v1807_v2, %s3732_s18 }
 0x1be   : > { %1958 = vrot.lane.b32.xlu1 %v1766_v58, %s3733_s27  ;;  %1972 = vrot.lane.b32.xlu0 %v1821_v45, %s3731_s28 }
 0x1c2   : > { %1978 = vrot.lane.b32.xlu0 %v1835_v46, %s3733_s27  ;;  %1948 = vrot.lane.b32.xlu1 %v1741_v24, %s3732_s18  ;;  %v3674_v46 = vld [vmem:[%s5186_s3 + $0xb0] sm:$0xff]  }
 0x1c6   : > { %1954 = vrot.lane.b32.xlu1 %v1755_v32, %s3731_s28 }
 0x1ca   : > { %1960 = vrot.lane.b32.xlu1 %v1769_v62, %s3733_s27 }
 0x1d8   : > { %v1843_v52 = vpop.permute.xlu0 %1842 }
 0x1d9   : > { %v1982_v18 = vsel %vm1980_vm4, %v1352_v0, %v1843_v52  ;;  %v3678_v0 = vld [vmem:[%s5186_s3 + $0xa0] sm:$0xff]  }
 0x1dc   : > { %v1861_v40 = vpop.permute.xlu0 %1860 }
 0x1dd   : > { %v1994_v35 = vsel %vm799_vm0, %v1982_v18, %v1861_v40  ;;  %v3677_v40 = vld [vmem:[%s5186_s3 + $0xe0] sm:$0xff]  }
 0x1e0   : > { %v1879_v9 = vpop.permute.xlu0 %1878  ;;  %v1845_v60 = vpop.permute.xlu1 %1844 }
 0x1e1   : > { %v2007_v27 = vsel %vm2005_vm5, %v1994_v35, %v1879_v9  ;;  %v1984_v63 = vsel %vm1980_vm4, %v4642_v61, %v1845_v60  ;;  %v3679_v35 = vld [vmem:[%s5186_s3 + $0xd8] sm:$0xff]  }
 0x1e2   : > { %v2097_v13 = vsel %vm4833_vm8, %v2007_v27, 0 }
 0x1e4   : > { %v1897_v50 = vpop.permute.xlu0 %1896  ;;  %v1863_v31 = vpop.permute.xlu1 %1862 }
 0x1e5   : > { %v1996_v17 = vsel %vm799_vm0, %v1984_v63, %v1863_v31  ;;  %v2025_v61 = vsel %vm1980_vm4, %v4646_v4, %v1897_v50 }
 0x1e8   : > { %v1915_v48 = vpop.permute.xlu0 %1914  ;;  %v1881_v56 = vpop.permute.xlu1 %1880 }
 0x1e9   : > { %v2010_v21 = vsel %vm2005_vm5, %v1996_v17, %v1881_v56  ;;  %v2037_v12 = vsel %vm799_vm0, %v2025_v61, %v1915_v48  ;;  %v3680_v17 = vld [vmem:[%s5186_s3 + $0x98] sm:$0xff]  }
 0x1ea   : > { %v4846_v33 = vsel %vm4833_vm8, %v2010_v21, 0  ;;  %v3681_v21 = vld [vmem:[%s5186_s3 + $0xd0] sm:$0xff]  }
 0x1eb   : > { %v3283_v39 = vcombine.low %v2097_v13, %v4846_v33 }
 0x1ec   : > { %v1933_v55 = vpop.permute.xlu0 %1932  ;;  %v1899_v20 = vpop.permute.xlu1 %1898 }
 0x1ed   : > { %v2049_v53 = vsel %vm2005_vm5, %v2037_v12, %v1933_v55  ;;  %v2027_v2 = vsel %vm1980_vm4, %v4650_v47, %v1899_v20  ;;  %v3672_v47 = vld [vmem:[%s5186_s3 + $0xb8] sm:$0xff]  }
 0x1ee   : > { %v2098_v30 = vsel %vm4833_vm8, %v2049_v53, 0  ;;  %v3684_v53 = vld [vmem:[%s5186_s3 + $0x88] sm:$0xff]  }
 0x1f0   : > { %v1847_v22 = vpop.permute.xlu0 %1846  ;;  %v1917_v7 = vpop.permute.xlu1 %1916 }
 0x1f1   : > { %v2039_v11 = vsel %vm799_vm0, %v2027_v2, %v1917_v7  ;;  %v1986_v4 = vsel %vm1980_vm4, %v4654_v29, %v1847_v22  ;;  %v3683_v7 = vld [vmem:[%s5186_s3 + $0xc8] sm:$0xff]  }
 0x1f4   : > { %v1865_v43 = vpop.permute.xlu0 %1864  ;;  %v1935_v1 = vpop.permute.xlu1 %1934 }
 0x1f5   : > { %v2052_v6 = vsel %vm2005_vm5, %v2039_v11, %v1935_v1  ;;  %v1998_v45 = vsel %vm799_vm0, %v1986_v4, %v1865_v43  ;;  %v3685_v43 = vld [vmem:[%s5186_s3 + $0xc0] sm:$0xff]  }
 0x1f6   : > { %v4861_v51 = vsel %vm4833_vm8, %v2052_v6, 0  ;;  %v3686_v1 = vld [vmem:[%s5186_s3 + $0x80] sm:$0xff]  }
 0x1f7   : > { %v3284_v58 = vcombine.low %v2098_v30, %v4861_v51 }
 0x1f8   : > { %v1883_v15 = vpop.permute.xlu0 %1882  ;;  %v1849_v49 = vpop.permute.xlu1 %1848 }
 0x1f9   : > { %v2013_v44 = vsel %vm2005_vm5, %v1998_v45, %v1883_v15  ;;  %2464 = vmatprep.mubr.bf16.mxu1 %v3284_v58  ;;  %v1988_v32 = vsel %vm1980_vm4, %v4672_v42, %v1849_v49 }
 0x1fa   : > { %v4876_v29 = vsel %vm4833_vm8, %v2013_v44, 0  ;;  %2465 = vmatmul.mubr.bf16.vlgmr.msra.gmra.mxu1 %v3283_v39  ;;  %v3682_v39 = vld [vmem:[%s5186_s3 + $0x90] sm:$0xff]  }
 0x1fb   : > { %v3285_v19 = vcombine.low %v4846_v33, %v4876_v29  ;;  %3499 = vmatpush3.bf16.msra.mxu1 %v3672_v47 }
 0x1fc   : > { %v1901_v24 = vpop.permute.xlu0 %1900  ;;  %v1867_v16 = vpop.permute.xlu1 %1866  ;;  %3500 = vmatprep.subr.bf16.mxu1 %v3673_v14 }
 0x1fd   : > { %v2000_v8 = vsel %vm799_vm0, %v1988_v32, %v1867_v16  ;;  %v2029_v42 = vsel %vm1980_vm4, %v4676_v57, %v1901_v24 }
 0x1ff   : > { %3501 = vmatpush3.bf16.msra.mxu1 %v3674_v46 }
 0x200   : > { %v1919_v62 = vpop.permute.xlu0 %1918  ;;  %v1885_v52 = vpop.permute.xlu1 %1884  ;;  %3502 = vmatprep.subr.bf16.mxu1 %v3675_v36 }
 0x201   : > { %v2016_v9 = vsel %vm2005_vm5, %v2000_v8, %v1885_v52  ;;  %v2041_v50 = vsel %vm799_vm0, %v2029_v42, %v1919_v62 }
 0x202   : > { %v2105_v60 = vsel %vm4833_vm8, %v2016_v9, 0 }
 0x203   : > { %v3287_v26 = vcombine.low %v4876_v29, %v2105_v60  ;;  %3503 = vmatpush3.bf16.msra.mxu1 %v3676_v59 }
 0x204   : > { %v1937_v31 = vpop.permute.xlu0 %1936  ;;  %v1903_v18 = vpop.permute.xlu1 %1902  ;;  %3504 = vmatprep.subr.bf16.mxu1 %v3677_v40 }
 0x205   : > { %v2055_v27 = vsel %vm2005_vm5, %v2041_v50, %v1937_v31  ;;  %v2031_v13 = vsel %vm1980_vm4, %v4680_v23, %v1903_v18 }
 0x206   : > { %v4911_v57 = vsel %vm4833_vm8, %v2055_v27, 0 }
 0x207   : > { %v3286_v63 = vcombine.low %v4861_v51, %v4911_v57  ;;  %3505 = vmatpush3.bf16.msra.mxu1 %v3678_v0 }
 0x208   : > { %v1851_v48 = vpop.permute.xlu0 %1850  ;;  %v1921_v56 = vpop.permute.xlu1 %1920  ;;  %3506 = vmatprep.subr.bf16.mxu1 %v3679_v35 }
 0x209   : > { %v2043_v55 = vsel %vm799_vm0, %v2031_v13, %v1921_v56  ;;  %v1990_v36 = vsel %vm1980_vm4, %v4686_v34, %v1851_v48 }
 0x20b   : > { %3507 = vmatpush3.bf16.msra.mxu1 %v3680_v17 }
 0x20c   : > { %v1869_v20 = vpop.permute.xlu0 %1868  ;;  %v1939_v22 = vpop.permute.xlu1 %1938  ;;  %3508 = vmatprep.subr.bf16.mxu1 %v3681_v21 }
 0x20d   : > { %v2058_v61 = vsel %vm2005_vm5, %v2043_v55, %v1939_v22  ;;  %v2002_v59 = vsel %vm799_vm0, %v1990_v36, %v1869_v20 }
 0x20e   : > { %v2106_v12 = vsel %vm4833_vm8, %v2058_v61, 0 }
 0x20f   : > { %v3288_v23 = vcombine.low %v4911_v57, %v2106_v12  ;;  %3509 = vmatpush3.bf16.msra.mxu1 %v3682_v39 }
 0x210   : > { %v1887_v2 = vpop.permute.xlu0 %1886  ;;  %v1853_v11 = vpop.permute.xlu1 %1852  ;;  %3510 = vmatprep.subr.bf16.mxu1 %v3683_v7 }
 0x211   : > { %2472 = vmatprep.mubr.bf16.mxu1 %v3288_v23  ;;  %v1992_v62 = vsel %vm1980_vm4, %v4705_v37, %v1853_v11  ;;  %v3687_v11 = vld [vmem:[%s5188_s5 + $0x78] sm:$0xff]  }
 0x212   : > { %2473 = vmatmul.mubr.bf16.gmra.mxu1 %v3287_v26  ;;  %3532 = vmatprep.subr.bf16.mxu0 %v3687_v11 }
 0x213   : > { %3511 = vmatpush3.bf16.msra.mxu1 %v3684_v53 }
 0x214   : > { %v1905_v6 = vpop.permute.xlu0 %1904  ;;  %v1871_v30 = vpop.permute.xlu1 %1870  ;;  %3512 = vmatprep.subr.bf16.mxu1 %v3685_v43  ;;  %v3688_v43 = vld [vmem:[%s5188_s5 + $0x38] sm:$0xff]  }
 0x215   : > { %v2033_v15 = vsel %vm1980_vm4, %v4721_v28, %v1905_v6  ;;  %v2004_v40 = vsel %vm799_vm0, %v1992_v62, %v1871_v30  ;;  %3533 = vmatpush3.bf16.msra.mxu0 %v3688_v43  ;;  %v3699_v6 = vld [vmem:[%s5188_s5 + $0xf8] sm:$0xff]  }
 0x216   : > { %v3700_v30 = vld [vmem:[%s5188_s5 + $0xb8] sm:$0xff]  }
 0x217   : > { %3513 = vmatpush3.bf16.msra.mxu1 %v3686_v1  ;;  %v3691_v1 = vld [vmem:[%s5188_s5 + $0x68] sm:$0xff]  }
 0x218   : > { %v1923_v4 = vpop.permute.xlu0 %1922  ;;  %v1907_v58 = vpop.permute.xlu1 %1906  ;;  %3554 = vmatprep.subr.bf16.mxu1 %v3699_v6  ;;  %v3712_v6 = vld [vmem:[%s5188_s5 + $0x98] sm:$0xff]  }
 0x219   : > { %v2045_v49 = vsel %vm799_vm0, %v2033_v15, %v1923_v4  ;;  %v2035_v14 = vsel %vm1980_vm4, %v4725_v54, %v1907_v58  ;;  %v2019_v54 = vsel %vm2005_vm5, %v2002_v59, %v1887_v2  ;;  %v3692_v4 = vld [vmem:[%s5188_s5 + $0x28] sm:$0xff]   ;;  %v3693_v58 = vld [vmem:[%s5188_s5 + $0x60] sm:$0xff]   ;;  %v3696_v15 = vld [vmem:[%s5188_s5 + $0x18] sm:$0xff]  }
 0x21a   : > { %v2107_v42 = vsel %vm4833_vm8, %v2019_v54, 0 }
 0x21c   : > { %v1941_v47 = vpop.permute.xlu0 %1940  ;;  %v1925_v45 = vpop.permute.xlu1 %1924 }
 0x21d   : > { %v2061_v44 = vsel %vm2005_vm5, %v2045_v49, %v1941_v47  ;;  %v2047_v46 = vsel %vm799_vm0, %v2035_v14, %v1925_v45  ;;  %v3694_v47 = vld [vmem:[%s5188_s5 + $0x20] sm:$0xff]   ;;  %v3695_v45 = vld [vmem:[%s5188_s5 + $0x58] sm:$0xff]   ;;  %v3697_v49 = vld [vmem:[%s5188_s5 + $0x50] sm:$0xff]  }
 0x21e   : > { %v2108_v28 = vsel %vm4833_vm8, %v2061_v44, 0  ;;  %v3698_v14 = vld [vmem:[%s5188_s5 + $0x10] sm:$0xff]  }
 0x220   : > { %v1965_v24 = vpop.permute.xlu0 %1964  ;;  %v1943_v16 = vpop.permute.xlu1 %1942 }
 0x221   : > { %v2064_v32 = vsel %vm2005_vm5, %v2047_v46, %v1943_v16  ;;  %v2081_v0 = vsel %vm1980_vm4, %v4729_v41, %v1965_v24 }
 0x222   : > { %v2110_v8 = vsel %vm4833_vm8, %v2064_v32, 0 }
 0x223   : > { %v3292_v52 = vcombine.low %v2108_v28, %v2110_v8 }
 0x224   : > { %v1971_v9 = vpop.permute.xlu0 %1970  ;;  %v1889_v34 = vpop.permute.xlu1 %1888 }
 0x225   : > { %v2022_v60 = vsel %vm2005_vm5, %v2004_v40, %v1889_v34  ;;  %2480 = vmatprep.mubr.bf16.mxu1 %v3292_v52  ;;  %v2085_v37 = vsel %vm799_vm0, %v2081_v0, %v1971_v9  ;;  %v5042_v9 = vld [vmem:[%s5187_s4] ss:$0 sm:$0xff] }
 0x226   : > { %v2109_v26 = vsel %vm4833_vm8, %v2022_v60, 0 }
 0x227   : > { %v3291_v50 = vcombine.low %v2107_v42, %v2109_v26 }
 0x228   : > { %v1977_v31 = vpop.permute.xlu0 %1976  ;;  %v1947_v18 = vpop.permute.xlu1 %1946 }
 0x229   : > { %v2089_v35 = vsel %vm2005_vm5, %v2085_v37, %v1977_v31  ;;  %2481 = vmatmul.mubr.bf16.gmra.mxu1 %v3291_v50  ;;  %v2067_v41 = vsel %vm1980_vm4, %v4743_v5, %v1947_v18  ;;  %v3701_v50 = vld [vmem:[%s5188_s5 + $0xf0] sm:$0xff]   ;;  %v3703_v31 = vld [vmem:[%s5188_s5 + $0x48] sm:$0xff]  }
 0x22a   : > { %v2104_v27 = vsel %vm4833_vm8, %v2089_v35, 0  ;;  %2521 = vmatprep.mubr.bf16.mxu1 %v3286_v63  ;;  %v3702_v37 = vld [vmem:[%s5188_s5 + $0xb0] sm:$0xff]  }
 0x22b   : > { %v3290_v17 = vcombine.low %v2104_v27, %v2108_v28 }
 0x22c   : > { %v1967_v48 = vpop.permute.xlu0 %1966  ;;  %v1953_v56 = vpop.permute.xlu1 %1952 }
 0x22d   : > { %v2071_v21 = vsel %vm799_vm0, %v2067_v41, %v1953_v56  ;;  %v2083_v57 = vsel %vm1980_vm4, %v4747_v38, %v1967_v48  ;;  %v3704_v41 = vld [vmem:[%s5188_s5 + $0x8] sm:$0xff]  }
 0x230   : > { %v1973_v13 = vpop.permute.xlu0 %1972  ;;  %v1959_v39 = vpop.permute.xlu1 %1958 }
 0x231   : > { %v2075_v55 = vsel %vm2005_vm5, %v2071_v21, %v1959_v39  ;;  %2522 = vmatmul.mubr.bf16.vlgmr.msra.gmra.mxu1 %v3285_v19  ;;  %v2087_v5 = vsel %vm799_vm0, %v2083_v57, %v1973_v13  ;;  %v3705_v21 = vld [vmem:[%s5188_s5 + $0xe8] sm:$0xff]  }
 0x232   : > { %v2103_v51 = vsel %vm4833_vm8, %v2075_v55, 0  ;;  %2529 = vmatprep.mubr.bf16.mxu1 %v3290_v17  ;;  %3555 = vmatpush3.bf16.msra.mxu1 %v3700_v30  ;;  %v3706_v13 = vld [vmem:[%s5188_s5 + $0xa8] sm:$0xff]  }
 0x233   : > { %v3289_v63 = vcombine.low %v2103_v51, %v2107_v42  ;;  %3556 = vmatprep.subr.bf16.mxu1 %v3701_v50 }
 0x234   : > { %v1979_v20 = vpop.permute.xlu0 %1978  ;;  %v1949_v22 = vpop.permute.xlu1 %1948 }
 0x235   : > { %v2092_v7 = vsel %vm2005_vm5, %v2087_v5, %v1979_v20  ;;  %v2069_v29 = vsel %vm1980_vm4, %v4751_v3, %v1949_v22  ;;  %v3689_v3 = vld [vmem:[%s5188_s5 + $0x70] sm:$0xff]  }
 0x236   : > { %v2112_v61 = vsel %vm4833_vm8, %v2092_v7, 0  ;;  %3534 = vmatprep.subr.bf16.mxu0 %v3689_v3  ;;  %3557 = vmatpush3.bf16.msra.mxu1 %v3702_v37  ;;  %v3707_v7 = vld [vmem:[%s5188_s5 + $0xe0] sm:$0xff]  }
 0x237   : > { %v3294_v12 = vcombine.low %v2110_v8, %v2112_v61  ;;  %3535 = vmatpush3.bf16.msra.mxu0 %v3690_v25  ;;  %3558 = vmatprep.subr.bf16.mxu1 %v3705_v21  ;;  %v3708_v61 = vld [vmem:[%s5188_s5 + $0xa0] sm:$0xff]  }
 0x238   : > { %v1955_v33 = vpop.permute.xlu1 %1954  ;;  %3536 = vmatprep.subr.bf16.mxu0 %v3691_v1  ;;  %v3710_v25 = vld [vmem:[%s5188_s5] sm:$0xff]   ;;  %v3711_v1 = vld [vmem:[%s5188_s5 + $0xd8] sm:$0xff]  }
 0x239   : > { %2530 = vmatmul.mubr.bf16.gmra.mxu1 %v3289_v63  ;;  %v2073_v19 = vsel %vm799_vm0, %v2069_v29, %v1955_v33 }
 0x23a   : > { %2537 = vmatprep.mubr.bf16.mxu1 %v3294_v12  ;;  %3559 = vmatpush3.bf16.msra.mxu1 %v3706_v13  ;;  %v3709_v12 = vld [vmem:[%s5188_s5 + $0x40] sm:$0xff]  }
 0x23b   : > { %3537 = vmatpush3.bf16.msra.mxu0 %v3692_v4  ;;  %3560 = vmatprep.subr.bf16.mxu1 %v3707_v7  ;;  %v3716_v7 = vld [vmem:[%s5188_s5 + $0x118] sm:$0xff]  }
 0x23c   : > { %v1961_v38 = vpop.permute.xlu1 %1960  ;;  %3538 = vmatprep.subr.bf16.mxu0 %v3693_v58 }
 0x23d   : > { %v2078_v23 = vsel %vm2005_vm5, %v2073_v19, %v1961_v38 }
 0x23e   : > { %v2111_v53 = vsel %vm4833_vm8, %v2078_v23, 0  ;;  %3561 = vmatpush3.bf16.msra.mxu1 %v3708_v61 }
 0x23f   : > { %v3293_v2 = vcombine.low %v2109_v26, %v2111_v53  ;;  %3539 = vmatpush3.bf16.msra.mxu0 %v3694_v47  ;;  %3562 = vmatprep.subr.bf16.mxu1 %v3711_v1 }
 0x240   : > { %3540 = vmatprep.subr.bf16.mxu0 %v3695_v45 }
 0x241   : > { %2538 = vmatmul.mubr.bf16.gmra.mxu1 %v3293_v2 }
 0x242   : > { %3563 = vmatpush3.bf16.msra.mxu1 %v3712_v6 }
 0x243   : > { %3541 = vmatpush3.bf16.msra.mxu0 %v3696_v15 }
 0x244   : > { %3542 = vmatprep.subr.bf16.mxu0 %v3697_v49 }
 0x247   : > { %3543 = vmatpush3.bf16.msra.mxu0 %v3698_v14 }
 0x248   : > { %3544 = vmatprep.subr.bf16.mxu0 %v3703_v31 }
 0x24b   : > { %3545 = vmatpush3.bf16.msra.mxu0 %v3704_v41 }
 0x24c   : > { %3546 = vmatprep.subr.bf16.mxu0 %v3709_v12 }
 0x24f   : > { %3547 = vmatpush3.bf16.msra.mxu0 %v3710_v25 }
 0x2ba   : > { %v3480_v44 = vpop.f32.mrf.mxu1 }
 0x2bc   : > { %v3481_v46 = vpop.f32.mrf.mxu1 }
 0x2bd   : > { %v3482_v40 = vadd.f32 %v3481_v46, %v3480_v44  ;;  %v3713_v44 = vld [vmem:[%s5188_s5 + $0xd0] sm:$0xff]  }
 0x2be   : > { %v3483_v24 = vpop.f32.mrf.mxu1  ;;  %v3714_v46 = vld [vmem:[%s5188_s5 + $0x90] sm:$0xff]   ;;  %3564 = vmatprep.subr.bf16.mxu1 %v3713_v44 }
 0x2bf   : > { %v2467_v42 = vadd.f32 %v3482_v40, %v5042_v9  ;;  %3565 = vmatpush3.bf16.msra.mxu1 %v3714_v46 }
 0x2c0   : > { %v3484_v16 = vpop.f32.mrf.mxu1 }
 0x2c1   : > { %v3485_v26 = vadd.f32 %v3484_v16, %v3483_v24 }
 0x2c3   : > { %v2470_v17 = vadd.f32 %v3485_v26, %v5042_v9  ;;  %v3718_v26 = vld [vmem:[%s5188_s5 + $0xc0] sm:$0xff]  }
 0x2d2   : > { %v3486_v36 = vpop.f32.mrf.mxu1 }
 0x2d4   : > { %v3487_v32 = vpop.f32.mrf.mxu1 }
 0x2d5   : > { %v3488_v48 = vadd.f32 %v3487_v32, %v3486_v36  ;;  %v3734_v32 = vmov 0.0  }
 0x2d6   : > { %v3489_v59 = vpop.f32.mrf.mxu1  ;;  %3581 = vmatprep.subr.bf16.mxu0 %v3734_v32 }
 0x2d7   : > { %v2475_v63 = vadd.f32 %v3488_v48, %v5042_v9 }
 0x2d8   : > { %v3490_v28 = vpop.f32.mrf.mxu1 }
 0x2d9   : > { %v3491_v5 = vadd.f32 %v3490_v28, %v3489_v59 }
 0x2db   : > { %v2478_v53 = vadd.f32 %v3491_v5, %v5042_v9 }
 0x2e9   : > { %v3492_v8 = vpop.f32.mrf.mxu1 }
 0x2eb   : > { %v3493_v54 = vpop.f32.mrf.mxu1 }
 0x2ec   : > { %v3494_v2 = vadd.f32 %v3493_v54, %v3492_v8 }
 0x2ed   : > { %v3495_v62 = vpop.f32.mrf.mxu1 }
 0x2ee   : > { %v2483_v45 = vadd.f32 %v3494_v2, %v5042_v9 }
 0x2ef   : > { %v3496_v52 = vpop.f32.mrf.mxu1 }
 0x2f0   : > { %v3497_v15 = vadd.f32 %v3496_v52, %v3495_v62  ;;  %v3715_v62 = vld [vmem:[%s5188_s5 + $0xc8] sm:$0xff]  }
 0x2f1   : > { %v3514_v34 = vpop.f32.mrf.mxu1  ;;  %v3717_v52 = vld [vmem:[%s5188_s5 + $0x88] sm:$0xff]   ;;  %3566 = vmatprep.subr.bf16.mxu1 %v3715_v62 }
 0x2f2   : > { %v2486_v28 = vadd.f32 %v3497_v15, %v5042_v9  ;;  %3567 = vmatpush3.bf16.msra.mxu1 %v3717_v52 }
 0x2f3   : > { %v3515_v60 = vpop.f32.mrf.mxu1  ;;  %3568 = vmatprep.subr.bf16.mxu1 %v3718_v26 }
 0x2f4   : > { %v3516_v0 = vadd.f32 %v3515_v60, %v3514_v34 }
 0x2f5   : > { %v3517_v18 = vpop.f32.mrf.mxu1 }
 0x2f6   : > { %v2524_v35 = vadd.f32 %v3516_v0, %v2467_v42  ;;  %v3720_v0 = vld [vmem:[%s5188_s5 + $0x80] sm:$0xff]  }
 0x2f7   : > { %v3518_v27 = vpop.f32.mrf.mxu1  ;;  %3569 = vmatpush3.bf16.msra.mxu1 %v3720_v0 }
 0x2f8   : > { %v3519_v56 = vadd.f32 %v3518_v27, %v3517_v18  ;;  %v2546_v55 = vmax.f32 %v2524_v35, 0.0 }
 0x2f9   : > { %v3520_v39 = vpop.f32.mrf.mxu1 }
 0x2fa   : > { %v2527_v51 = vadd.f32 %v3519_v56, %v2470_v17  ;;  %v5074_v29 = vpack.c.bf16 %v2546_v55, %v2546_v55 }
 0x2fb   : > { %v3521_v57 = vpop.f32.mrf.mxu1 }
 0x2fc   : > { %v2547_v20 = vmax.f32 %v2527_v51, 0.0  ;;  %v3522_v22 = vadd.f32 %v3521_v57, %v3520_v39  ;;  %v2569_v58 = vshrl.u32 %v5074_v29, 16  ;;  %v2578_v17 = vrot.slane %v5074_v29, 1 }
 0x2fd   : > { %v3523_v33 = vpop.f32.mrf.mxu1 }
 0x2fe   : > { %v5076_v19 = vpack.c.bf16 %v2547_v20, %v2547_v20  ;;  %v2532_v38 = vadd.f32 %v3522_v22, %v2475_v63 }
 0x2ff   : > { %v3524_v23 = vpop.f32.mrf.mxu1 }
 0x300   : > { %v2548_v11 = vmax.f32 %v2532_v38, 0.0  ;;  %v3525_v43 = vadd.f32 %v3524_v23, %v3523_v33  ;;  %2582 = vrot.lane.b32.xlu0 %v5076_v19, %s3731_s28  ;;  %v2592_v42 = vrot.slane %v5076_v19, 1  ;;  %v2587_v38 = vshrl.u32 %v5076_v19, 16 }
 0x301   : > { %v3526_v3 = vpop.f32.mrf.mxu1 }
 0x302   : > { %v5090_v30 = vpack.c.bf16 %v2548_v11, %v2548_v11  ;;  %v2535_v4 = vadd.f32 %v3525_v43, %v2478_v53  ;;  %v3719_v11 = vld [vmem:[%s5188_s5 + $0x110] sm:$0xff]  }
 0x303   : > { %v3527_v47 = vpop.f32.mrf.mxu1 }
 0x304   : > { %v3528_v49 = vadd.f32 %v3527_v47, %v3526_v3  ;;  %2574 = vrot.lane.b32.xlu0 %v2569_v58, %s3731_s28  ;;  %v2549_v24 = vmax.f32 %v2535_v4, 0.0  ;;  %v2599_v36 = vshrl.u32 %v5090_v30, 16  ;;  %v3721_v58 = vld [vmem:[%s5188_s5 + $0x108] sm:$0xff]   ;;  %v2608_v15 = vrot.slane %v5090_v30, 1 }
 0x305   : > { %v3529_v14 = vpop.f32.mrf.mxu1 }
 0x306   : > { %v2540_v16 = vadd.f32 %v3528_v49, %v2483_v45  ;;  %v3396_v40 = vpack.c.bf16 %v2549_v24, %v2549_v24  ;;  %v3722_v49 = vld [vmem:[%s5188_s5 + $0x100] sm:$0xff]   ;;  %v2644_v44 = vsel %vm4186_vm3, %v2608_v15, 0 }
 0x307   : > { %v3530_v59 = vpop.f32.mrf.mxu1 }
 0x308   : > { %v2550_v8 = vmax.f32 %v2540_v16, 0.0  ;;  %v3531_v54 = vadd.f32 %v3530_v59, %v3529_v14  ;;  %2604 = vrot.lane.b32.xlu0 %v2599_v36, %s3731_s28  ;;  %v2572_v37 = vshrl.u32 %v3396_v40, 16  ;;  %v2579_v56 = vrot.slane %v3396_v40, 1  ;;  %v3333_v59 = vld [vmem:[%s5189_s6] ss:$0 sm:$0xff] }
 0x30a   : > { %v3399_v34 = vpack.c.bf16 %v2550_v8, %v2550_v8  ;;  %v2543_v60 = vadd.f32 %v3531_v54, %v2486_v28 }
 0x30c   : > { %v2551_v9 = vmax.f32 %v2543_v60, 0.0  ;;  %2594 = vrot.lane.b32.xlu0 %v2592_v42, %s3731_s28  ;;  %2584 = vrot.lane.b32.xlu1 %v3399_v34, %s3731_s28  ;;  %v2593_v18 = vrot.slane %v3399_v34, 1  ;;  %v2590_v3 = vshrl.u32 %v3399_v34, 16 }
 0x30e   : > { %v3397_v50 = vpack.c.bf16 %v2551_v9, %v2551_v9 }
 0x310   : > { %2576 = vrot.lane.b32.xlu1 %v2572_v37, %s3731_s28  ;;  %v2602_v31 = vshrl.u32 %v3397_v50, 16  ;;  %v2609_v45 = vrot.slane %v3397_v50, 1 }
 0x312   : > { %v2649_v14 = vsel %vm4186_vm3, %v2609_v45, 0 }
 0x313   : > { %v3338_v46 = vcombine.low %v2644_v44, %v2649_v14 }
 0x314   : > { %2606 = vrot.lane.b32.xlu1 %v2602_v31, %s3731_s28 }
 0x318   : > { %2596 = vrot.lane.b32.xlu1 %v2593_v18, %s3731_s28 }
 0x372   : > { %v2583_v35 = vpop.permute.xlu0 %2582 }
 0x373   : > { %v2620_v48 = vsel %vm799_vm0, %v2578_v17, %v2583_v35 }
 0x374   : > { %v2641_v13 = vsel %vm4186_vm3, %v2620_v48, 0 }
 0x376   : > { %v2575_v27 = vpop.permute.xlu0 %2574 }
 0x377   : > { %v2613_v51 = vsel %vm799_vm0, %v5074_v29, %v2575_v27 }
 0x378   : > { %v2640_v20 = vsel %vm4186_vm3, %v2613_v51, 0 }
 0x37a   : > { %v2605_v39 = vpop.permute.xlu0 %2604 }
 0x37b   : > { %v2635_v61 = vsel %vm799_vm0, %v5090_v30, %v2605_v39 }
 0x37c   : > { %v2643_v53 = vsel %vm4186_vm3, %v2635_v61, 0 }
 0x37e   : > { %v2585_v41 = vpop.permute.xlu1 %2584  ;;  %v2595_v33 = vpop.permute.xlu0 %2594 }
 0x37f   : > { %v2624_v21 = vsel %vm799_vm0, %v2579_v56, %v2585_v41  ;;  %v2628_v43 = vsel %vm799_vm0, %v2587_v38, %v2595_v33 }
 0x380   : > { %v2646_v55 = vsel %vm4186_vm3, %v2624_v21, 0  ;;  %v2642_v6 = vsel %vm4186_vm3, %v2628_v43, 0 }
 0x381   : > { %v3335_v57 = vcombine.low %v2641_v13, %v2646_v55 }
 0x382   : > { %v2577_v63 = vpop.permute.xlu1 %2576 }
 0x383   : > { %v2616_v5 = vsel %vm799_vm0, %v3396_v40, %v2577_v63  ;;  %3009 = vmatprep.mubr.bf16.mxu0 %v3335_v57 }
 0x384   : > { %v2645_v22 = vsel %vm4186_vm3, %v2616_v5, 0 }
 0x385   : > { %v3334_v12 = vcombine.low %v2640_v20, %v2645_v22 }
 0x386   : > { %v2607_v29 = vpop.permute.xlu1 %2606 }
 0x387   : > { %v2638_v23 = vsel %vm799_vm0, %v3397_v50, %v2607_v29  ;;  %3010 = vmatmul.mubr.bf16.vlgmr.msra.gmra.mxu0 %v3334_v12 }
 0x388   : > { %v2648_v2 = vsel %vm4186_vm3, %v2638_v23, 0  ;;  %3582 = vmatpush3.bf16.msra.mxu0 %v3716_v7  ;;  %3589 = vmatprep.mubr.msk.bf16.mxu0 %vm3735_vm9, %v3734_v32 }
 0x389   : > { %v3337_v19 = vcombine.low %v2643_v53, %v2648_v2  ;;  %3583 = vmatprep.subr.bf16.mxu0 %v3734_v32 }
 0x38a   : > { %v2597_v25 = vpop.permute.xlu1 %2596 }
 0x38b   : > { %v2632_v1 = vsel %vm799_vm0, %v2590_v3, %v2597_v25  ;;  %3050 = vmatprep.mubr.bf16.mxu1 %v3337_v19 }
 0x38c   : > { %v2647_v4 = vsel %vm4186_vm3, %v2632_v1, 0  ;;  %3584 = vmatpush3.bf16.msra.mxu0 %v3719_v11 }
 0x38d   : > { %v3336_v47 = vcombine.low %v2642_v6, %v2647_v4  ;;  %3585 = vmatprep.subr.bf16.mxu0 %v3734_v32 }
 0x38f   : > { %3051 = vmatmul.mubr.bf16.vlgmr.msra.gmra.mxu1 %v3336_v47 }
 0x390   : > { %3586 = vmatpush3.bf16.msra.mxu0 %v3721_v58 }
 0x391   : > { %3587 = vmatprep.subr.bf16.mxu0 %v3734_v32 }
 0x394   : > { %3588 = vmatpush3.bf16.msra.mxu0 %v3722_v49 }
 0x397   : > { %3590 = vmatmul.mubr.msk.bf16.vlgmr.msra.gmra.mxu0 %vm799_vm0, %v3338_v46 }
 0x447   : > { %v3548_v24 = vpop.f32.mrf.mxu0 }
 0x449   : > { %v3549_v30 = vpop.f32.mrf.mxu0 }
 0x44a   : > { %v3550_v36 = vadd.f32 %v3549_v30, %v3548_v24 }
 0x44b   : > { %v3551_v16 = vpop.f32.mrf.mxu0 }
 0x44c   : > { %v3012_v54 = vadd.f32 %v3550_v36, %v3333_v59 }
 0x44d   : > { %v3552_v32 = vpop.f32.mrf.mxu0 }
 0x44e   : > { %v3553_v62 = vadd.f32 %v3552_v32, %v3551_v16 }
 0x44f   : > { %v3570_v28 = vpop.f32.mrf.mxu1 }
 0x450   : > { %v3015_v60 = vadd.f32 %v3553_v62, %v3333_v59 }
 0x451   : > { %v3571_v8 = vpop.f32.mrf.mxu1 }
 0x452   : > { %v3572_v10 = vadd.f32 %v3571_v8, %v3570_v28 }
 0x453   : > { %v3573_v52 = vpop.f32.mrf.mxu1 }
 0x454   : > { %v3053_v40 = vadd.f32 %v3572_v10, %v3012_v54 }
 0x455   : > { %v3574_v34 = vpop.f32.mrf.mxu1 }
 0x456   : > { %v3575_v42 = vadd.f32 %v3574_v34, %v3573_v52 }
 0x457   : > { %v3093_v9 = vpop.f32.mrf.mxu0 }
 0x458   : > { %v3094_v26 = vadd.f32 %v3093_v9, %v3053_v40  ;;  %v3056_v0 = vadd.f32 %v3575_v42, %v3015_v60 }
 0x459   : > { %v3591_v50 = vpop.f32.mrf.mxu0 }
 0x45a   : > { %v3100_v37 = vmax.f32 %v3094_v26, 0.0 }
 0x45b   : > { %v3096_v31 = vpop.f32.mrf.mxu0 }
 0x45c   : > { %3102 = vst [vmem:[%s283_s29] sm:$0xff] %v3100_v37  ;;  %v3097_v18 = vadd.f32 %v3096_v31, %v3056_v0 }
 0x45d   : > { %v3592_v35 = vpop.f32.mrf.mxu0 }
 0x45e   : > { %v3101_v27 = vmax.f32 %v3097_v18, 0.0 }
 0x460   : > { %3103 = vst [vmem:[%s283_s29 + $0x8] sm:$0xff] %v3101_v27 }
 0x461 PF: > { %s17_s24 = sadd.s32 1, %s3729_s24  }
 0x462   : > { %p14_p4 = scmp.ge.s32.totalorder %s17_s24, 4  }
 0x464   :  { %16 = sbr.rel (!%p14_p4) target bundleno = 1 (0x1), region = 79 }

</bundles_post_ra>
